<compile_context>
chip_gen: v6e
topology: v6e:2x2x1
jax: 0.10.0
libtpu: 0.0.40
codegen_flags: <defaults>
</compile_context>

<pallas_src>
import functools
import math

import jax
import jax.numpy as jnp
from jax.experimental import pallas as pl
from jax.experimental.pallas import tpu as pltpu

# ----------------------------------------------------------------------------
# Small-model config (stands in for the PyTorch `config` object).
CFG = dict(
    vocab_size=100,
    hidden_size=32,
    num_layers=2,
    num_heads=4,
    intermediate_size=64,
    max_position=16,
    type_vocab_size=2,
    seq_len=8,
    batch=2,
    layer_norm_eps=1e-12,
)

LANES = 128
_VMEM = lambda: pl.BlockSpec(memory_space=pltpu.MemorySpace.VMEM)

# Bias/LayerNorm slab row layout ([4 + 8*L rows, 128], padded to 8-row multiple)
ROW_EMB_G, ROW_EMB_B, ROW_POOL_B, ROW_CLS_B = 0, 1, 2, 3
ROW_LAYER0 = 4
ROWS_PER_LAYER = 8
(R_QKV_B, R_AO_B, R_A_LN_G, R_A_LN_B,
 R_I_B, R_O_B, R_O_LN_G, R_O_LN_B) = range(8)


# ----------------------------------------------------------------------------
# The fused kernel: embeddings-LN -> L x (fused QKV, MHA, out proj, LN,
# FFN(gelu), LN) -> pooler(tanh) on [CLS] -> regression head.
# ----------------------------------------------------------------------------
def _fused_bert_kernel(word_ref, pos_typ_ref, mask_ref, bias_ref,
                       w_h128_ref, w_hh_ref, w_128h_ref, o_ref,
                       *, B, S, H, nh, hd, L, eps):
    BS = B * S
    f32 = jnp.float32

    def brow(r, w=LANES):                       # bias-slab row r, first w lanes
        return bias_ref[r:r + 1, :w]

    def layer_norm(x, g, b):
        mean = jnp.mean(x, axis=-1, keepdims=True)
        xc = x - mean
        var = jnp.mean(xc * xc, axis=-1, keepdims=True)
        return xc * jax.lax.rsqrt(var + eps) * g + b

    def gelu(x):
        # TODO(synk): torch.nn.GELU defaults to exact erf-GELU; tanh approx used
        # here (EUP-friendly), numerically very close.
        c = math.sqrt(2.0 / math.pi)
        return 0.5 * x * (1.0 + jnp.tanh(c * (x + 0.044715 * x * x * x)))

    # --- embeddings: word + (position + token_type) -> LayerNorm --------------
    emb = word_ref[...].reshape(B, S, H) + pos_typ_ref[...][None]
    h = layer_norm(emb.reshape(BS, H), brow(ROW_EMB_G, H), brow(ROW_EMB_B, H))
    # dropout after embeddings: identity in inference mode.

    # Additive attention mask broadcast ONCE (JAX does not CSE broadcast_in_dim,
    # so broadcasting inside the unrolled loops would emit L*nh copies).
    mask_bqk = jnp.broadcast_to(mask_ref[...][:, None, :], (B, S, S))

    for l in range(L):
        rb = ROW_LAYER0 + l * ROWS_PER_LAYER

        # Fused QKV projection; N padded to 128 lanes; the 1/sqrt(hd) score
        # scale is already folded into the Q columns of the packed weight/bias.
        qkv = (jnp.dot(h, w_h128_ref[l], preferred_element_type=f32)
               + brow(rb + R_QKV_B))                               # [BS, 128]
        q = qkv[:, 0 * H:1 * H].reshape(B, S, H)
        k = qkv[:, 1 * H:2 * H].reshape(B, S, H)
        v = qkv[:, 2 * H:3 * H].reshape(B, S, H)

        ao_w = w_hh_ref[l]                                         # [H, H]

        # Multi-head attention.  Head concat is folded into the output
        # projection:  attn = sum_h  ctx_h @ Wo[h*hd:(h+1)*hd, :]
        # TODO(synk): replace the head loop with one two-batch-dim einsum once
        # Mosaic's dot_general supports it.
        attn = None
        for head in range(nh):
            sl = slice(head * hd, (head + 1) * hd)
            s = jnp.einsum("bqd,bkd->bqk", q[:, :, sl], k[:, :, sl],
                           preferred_element_type=f32)             # [B,S,S]
            s = s + mask_bqk
            p = jnp.exp(s - jnp.max(s, axis=-1, keepdims=True))
            p = p * pl.reciprocal(jnp.sum(p, axis=-1, keepdims=True), approx=True)
            ctx_h = jnp.einsum("bqk,bkd->bqd", p, v[:, :, sl],
                               preferred_element_type=f32)         # [B,S,hd]
            part = jnp.dot(ctx_h.reshape(BS, hd), ao_w[sl, :],
                           preferred_element_type=f32)             # [BS, H]
            attn = part if attn is None else attn + part
        attn = attn + brow(rb + R_AO_B, H)
        h = layer_norm(attn + h, brow(rb + R_A_LN_G, H), brow(rb + R_A_LN_B, H))

        # FFN; intermediate N and output K padded to 128 lanes (padding columns
        # carry exact zeros: zero weights + zero bias -> gelu(0) == 0).
        inter = gelu(jnp.dot(h, w_h128_ref[L + l], preferred_element_type=f32)
                     + brow(rb + R_I_B))                           # [BS, 128]
        ff = (jnp.dot(inter, w_128h_ref[l], preferred_element_type=f32)
              + brow(rb + R_O_B, H))
        h = layer_norm(ff + h, brow(rb + R_O_LN_G, H), brow(rb + R_O_LN_B, H))

    # --- pooler (tanh dense on [CLS]) + regression head (N padded to 128) -----
    cls_tok = h.reshape(B, S, H)[:, 0, :]                          # [B, H]
    pooled = jnp.tanh(jnp.dot(cls_tok, w_hh_ref[L], preferred_element_type=f32)
                      + brow(ROW_POOL_B, H))
    # dropout on pooled_output: identity in inference mode.
    logits = (jnp.dot(pooled, w_h128_ref[2 * L], preferred_element_type=f32)
              + brow(ROW_CLS_B))                                   # [B,128]; col 0 real
    o_ref[...] = logits.astype(o_ref.dtype)


# ----------------------------------------------------------------------------
# Parameter init (deterministic, synthetic), kept in "PyTorch-like" layout.
# ----------------------------------------------------------------------------
def init_params(key, cfg):
    H, I, L = cfg["hidden_size"], cfg["intermediate_size"], cfg["num_layers"]
    std = 0.02
    ks = iter(jax.random.split(key, 16))
    nrm = lambda shape: std * jax.random.normal(next(ks), shape, jnp.float32)

    return {
        "word_emb": nrm((cfg["vocab_size"], H)),
        "pos_emb": nrm((cfg["max_position"], H)),
        "type_emb": nrm((cfg["type_vocab_size"], H)),
        "emb_ln_g": jnp.ones((1, H), jnp.float32),
        "emb_ln_b": jnp.zeros((1, H), jnp.float32),
        "qkv_w": nrm((L, H, 3 * H)), "qkv_b": jnp.zeros((L, 1, 3 * H), jnp.float32),
        "ao_w": nrm((L, H, H)),      "ao_b": jnp.zeros((L, 1, H), jnp.float32),
        "a_ln_g": jnp.ones((L, 1, H), jnp.float32),
        "a_ln_b": jnp.zeros((L, 1, H), jnp.float32),
        "i_w": nrm((L, H, I)),       "i_b": jnp.zeros((L, 1, I), jnp.float32),
        "o_w": nrm((L, I, H)),       "o_b": jnp.zeros((L, 1, H), jnp.float32),
        "o_ln_g": jnp.ones((L, 1, H), jnp.float32),
        "o_ln_b": jnp.zeros((L, 1, H), jnp.float32),
        "pooler_w": nrm((H, H)), "pooler_b": jnp.zeros((1, H), jnp.float32),
        "cls_w": nrm((H, 1)),    "cls_b": jnp.zeros((1, 1), jnp.float32),
    }


# ----------------------------------------------------------------------------
# Pack parameters into a small number of lane-dense kernel operands.
# ----------------------------------------------------------------------------
def pack_params(params, cfg):
    H, I, L = cfg["hidden_size"], cfg["intermediate_size"], cfg["num_layers"]
    nh = cfg["num_heads"]
    hd = H // nh
    f32 = jnp.float32

    # Fold the 1/sqrt(hd) attention score scale into the Q columns of the fused
    # QKV weight + bias (deletes one VPU multiply over the scores per head/layer).
    col_scale = jnp.concatenate(
        [jnp.full((H,), 1.0 / math.sqrt(hd), f32), jnp.ones((2 * H,), f32)])
    qkv_w = params["qkv_w"] * col_scale            # [L, H, 3H]
    qkv_b = params["qkv_b"] * col_scale            # [L, 1, 3H]

    def pad_last(x, n):
        return jnp.pad(x, [(0, 0)] * (x.ndim - 1) + [(0, n - x.shape[-1])])

    # H->128 weight slab: [qkv_w (L)] + [i_w (L)] + [cls_w (1)] -> [2L+1, H, 128]
    w_h128 = jnp.concatenate([
        pad_last(qkv_w, LANES),
        pad_last(params["i_w"], LANES),
        pad_last(params["cls_w"], LANES)[None],
    ], axis=0)

    # H->H weight slab: [ao_w (L)] + [pooler_w (1)] -> [L+1, H, H]
    w_hh = jnp.concatenate([params["ao_w"], params["pooler_w"][None]], axis=0)

    # 128->H weight slab: o_w with K padded 64 -> 128 (zero rows) -> [L, 128, H]
    w_128h = jnp.pad(params["o_w"], ((0, 0), (0, LANES - I), (0, 0)))

    # Bias / LayerNorm slab: one lane-dense [24, 128] array instead of ~18 tiny
    # inputs (one DMA descriptor instead of many masked sub-(8,128) loads).
    rows = [params["emb_ln_g"], params["emb_ln_b"],
            params["pooler_b"], params["cls_b"]]
    for l in range(L):
        rows += [qkv_b[l], params["ao_b"][l], params["a_ln_g"][l],
                 params["a_ln_b"][l], params["i_b"][l], params["o_b"][l],
                 params["o_ln_g"][l], params["o_ln_b"][l]]
    rows = [pad_last(r.reshape(1, -1), LANES).astype(f32) for r in rows]
    n_pad = (-len(rows)) % 8
    bias = jnp.concatenate(rows + [jnp.zeros((n_pad, LANES), f32)], axis=0)

    return {"w_h128": w_h128, "w_hh": w_hh, "w_128h": w_128h, "bias": bias}


# ----------------------------------------------------------------------------
# Forward pass: embedding gather in XLA glue, everything else in ONE kernel.
# ----------------------------------------------------------------------------
def my_bert_forward(params, input_ids, labels=None, attention_mask=None, cfg=CFG):
    B, S = input_ids.shape
    H, nh, L = cfg["hidden_size"], cfg["num_heads"], cfg["num_layers"]
    hd = H // nh

    if attention_mask is None:
        attention_mask = jnp.ones((B, S), jnp.float32)
    add_mask = (1.0 - attention_mask.astype(jnp.float32)) * -1e9          # [B, S]

    # Embedding-table gather stays in XLA (data-dependent row lookup).
    word = jnp.take(params["word_emb"], input_ids.reshape(-1), axis=0)    # [B*S, H]
    # position + token-type embedding combined into a single [S, H] operand.
    # TODO(synk): token_type_ids assumed all-zero (row 0 of the type table).
    pos_typ = params["pos_emb"][:S] + params["type_emb"][0:1]

    packed = pack_params(params, cfg)
    operands = (word, pos_typ, add_mask, packed["bias"],
                packed["w_h128"], packed["w_hh"], packed["w_128h"])

    # Advisory cost hint so XLA can schedule the gather / glue around the call.
    BS = B * S
    flops = int(L * (2 * BS * H * LANES + 4 * B * nh * S * S * hd
                     + 2 * BS * H * H + 2 * BS * H * LANES + 2 * BS * LANES * H)
                + 2 * B * H * H + 2 * B * H * LANES)
    transcendentals = int(L * (B * nh * S * S + BS * LANES) + B * H)
    bytes_accessed = int(sum(int(x.size) * x.dtype.itemsize for x in operands)
                         + B * LANES * 4)

    kernel = functools.partial(
        _fused_bert_kernel, B=B, S=S, H=H, nh=nh, hd=hd, L=L,
        eps=cfg["layer_norm_eps"])

    vmem = _VMEM()
    logits_pad = pl.pallas_call(
        kernel,
        out_shape=jax.ShapeDtypeStruct((B, LANES), jnp.float32),
        in_specs=[vmem] * len(operands),
        out_specs=vmem,
        cost_estimate=pl.CostEstimate(flops=flops,
                                      transcendentals=transcendentals,
                                      bytes_accessed=bytes_accessed),
        compiler_params=pltpu.CompilerParams(vmem_limit_bytes=32 * 1024 * 1024),
    )(*operands)
    logits = logits_pad[:, 0]                 # classifier N padded to 128; col 0 real

    if labels is not None:
        loss = jnp.mean((logits - labels) ** 2)                           # MSELoss
        return loss, logits
    return logits


# ----------------------------------------------------------------------------
# Pure-JAX reference (same math, unpacked params) for a sanity check.
# ----------------------------------------------------------------------------
def _reference_forward(params, input_ids, attention_mask, cfg=CFG):
    B, S = input_ids.shape
    H, nh, L = cfg["hidden_size"], cfg["num_heads"], cfg["num_layers"]
    hd = H // nh
    eps = cfg["layer_norm_eps"]

    def ln(x, g, b):
        m = jnp.mean(x, -1, keepdims=True)
        v = jnp.mean((x - m) ** 2, -1, keepdims=True)
        return (x - m) * jax.lax.rsqrt(v + eps) * g + b

    def gelu(x):
        c = math.sqrt(2.0 / math.pi)
        return 0.5 * x * (1.0 + jnp.tanh(c * (x + 0.044715 * x ** 3)))

    add_mask = (1.0 - attention_mask) * -1e9
    word = jnp.take(params["word_emb"], input_ids.reshape(-1), axis=0)
    emb = word.reshape(B, S, H) + params["pos_emb"][:S][None] + params["type_emb"][0:1][None]
    h = ln(emb.reshape(B * S, H), params["emb_ln_g"], params["emb_ln_b"])
    for l in range(L):
        qkv = h @ params["qkv_w"][l] + params["qkv_b"][l]
        q, k, v = (qkv[:, i * H:(i + 1) * H].reshape(B, S, nh, hd).transpose(0, 2, 1, 3)
                   for i in range(3))
        s = jnp.einsum("bhqd,bhkd->bhqk", q, k) / math.sqrt(hd) + add_mask[:, None, None, :]
        p = jax.nn.softmax(s, axis=-1)
        ctx = jnp.einsum("bhqk,bhkd->bhqd", p, v).transpose(0, 2, 1, 3).reshape(B * S, H)
        h = ln(ctx @ params["ao_w"][l] + params["ao_b"][l] + h,
               params["a_ln_g"][l], params["a_ln_b"][l])
        inter = gelu(h @ params["i_w"][l] + params["i_b"][l])
        h = ln(inter @ params["o_w"][l] + params["o_b"][l] + h,
               params["o_ln_g"][l], params["o_ln_b"][l])
    cls = h.reshape(B, S, H)[:, 0, :]
    pooled = jnp.tanh(cls @ params["pooler_w"] + params["pooler_b"])
    return (pooled @ params["cls_w"] + params["cls_b"])[:, 0]


# ----------------------------------------------------------------------------
if __name__ == "__main__":
    key = jax.random.PRNGKey(0)
    pkey, ikey, lkey = jax.random.split(key, 3)

    params = init_params(pkey, CFG)
    input_ids = jax.random.randint(
        ikey, (CFG["batch"], CFG["seq_len"]), 0, CFG["vocab_size"], dtype=jnp.int32)
    attention_mask = jnp.ones((CFG["batch"], CFG["seq_len"]), jnp.float32)
    labels = jax.random.normal(lkey, (CFG["batch"],), jnp.float32)

    # without labels -> logits only
    fwd = jax.jit(lambda p, ids, m: my_bert_forward(p, ids, attention_mask=m))
    logits = jax.block_until_ready(fwd(params, input_ids, attention_mask))
    assert logits.shape == (CFG["batch"],)
    assert bool(jnp.all(jnp.isfinite(logits)))

    # with labels -> (loss, logits)
    fwd_loss = jax.jit(
        lambda p, ids, lab, m: my_bert_forward(p, ids, labels=lab, attention_mask=m))
    loss, logits2 = jax.block_until_ready(
        fwd_loss(params, input_ids, labels, attention_mask))
    assert loss.shape == () and logits2.shape == (CFG["batch"],)
    assert bool(jnp.isfinite(loss))

    # sanity check vs. pure-JAX reference (approx reciprocal in softmax -> loose tol)
    ref = _reference_forward(params, input_ids, attention_mask)
    assert bool(jnp.allclose(logits, ref, atol=1e-2, rtol=1e-2)), (logits, ref)

    print("KERNEL_OK")
</pallas_src>

<mosaic_0001>
module attributes {stable_mosaic.version = 11 : i64} {
  func.func @_fused_bert_kernel(%arg0: memref<16x32xf32, #tpu.memory_space<vmem>>, %arg1: memref<8x32xf32, #tpu.memory_space<vmem>>, %arg2: memref<2x8xf32, #tpu.memory_space<vmem>>, %arg3: memref<24x128xf32, #tpu.memory_space<vmem>>, %arg4: memref<5x32x128xf32, #tpu.memory_space<vmem>>, %arg5: memref<3x32x32xf32, #tpu.memory_space<vmem>>, %arg6: memref<2x128x32xf32, #tpu.memory_space<vmem>>, %arg7: memref<2x128xf32, #tpu.memory_space<vmem>>) attributes {dimension_semantics = [], scalar_prefetch = 0 : i64, scratch_operands = 0 : i64, tpu.core_type = #tpu.core_type<tc>} {
    %c0 = arith.constant 0 : index
    %c0_0 = arith.constant 0 : index
    %0 = vector.load %arg0[%c0, %c0_0] : memref<16x32xf32, #tpu.memory_space<vmem>>, vector<16x32xf32>
    %1 = vector.shape_cast %0 : vector<16x32xf32> to vector<2x8x32xf32>
    %c0_1 = arith.constant 0 : index
    %c0_2 = arith.constant 0 : index
    %2 = vector.load %arg1[%c0_1, %c0_2] : memref<8x32xf32, #tpu.memory_space<vmem>>, vector<8x32xf32>
    %3 = vector.shape_cast %2 : vector<8x32xf32> to vector<1x8x32xf32>
    %4 = vector.broadcast %3 : vector<1x8x32xf32> to vector<2x8x32xf32>
    %5 = arith.addf %1, %4 : vector<2x8x32xf32>
    %6 = vector.shape_cast %5 : vector<2x8x32xf32> to vector<16x32xf32>
    %c0_3 = arith.constant 0 : index
    %c0_4 = arith.constant 0 : index
    %7 = vector.load %arg3[%c0_3, %c0_4] : memref<24x128xf32, #tpu.memory_space<vmem>>, vector<1x32xf32>
    %c1 = arith.constant 1 : index
    %c0_5 = arith.constant 0 : index
    %8 = vector.load %arg3[%c1, %c0_5] : memref<24x128xf32, #tpu.memory_space<vmem>>, vector<1x32xf32>
    %cst = arith.constant dense<0.000000e+00> : vector<16xf32>
    %9 = vector.multi_reduction <add>, %6, %cst [1] : vector<16x32xf32> to vector<16xf32>
    %10 = vector.shape_cast %9 : vector<16xf32> to vector<16x1xf32>
    %cst_6 = arith.constant 3.200000e+01 : f32
    %11 = vector.broadcast %cst_6 : f32 to vector<16x1xf32>
    %12 = arith.divf %10, %11 : vector<16x1xf32>
    %13 = vector.broadcast %12 : vector<16x1xf32> to vector<16x32xf32>
    %14 = arith.subf %6, %13 : vector<16x32xf32>
    %15 = arith.mulf %14, %14 : vector<16x32xf32>
    %cst_7 = arith.constant dense<0.000000e+00> : vector<16xf32>
    %16 = vector.multi_reduction <add>, %15, %cst_7 [1] : vector<16x32xf32> to vector<16xf32>
    %17 = vector.shape_cast %16 : vector<16xf32> to vector<16x1xf32>
    %cst_8 = arith.constant 3.200000e+01 : f32
    %18 = vector.broadcast %cst_8 : f32 to vector<16x1xf32>
    %19 = arith.divf %17, %18 : vector<16x1xf32>
    %cst_9 = arith.constant 9.99999996E-13 : f32
    %20 = vector.broadcast %cst_9 : f32 to vector<16x1xf32>
    %21 = arith.addf %19, %20 : vector<16x1xf32>
    %22 = math.rsqrt %21 : vector<16x1xf32>
    %23 = vector.broadcast %22 : vector<16x1xf32> to vector<16x32xf32>
    %24 = arith.mulf %14, %23 : vector<16x32xf32>
    %25 = vector.broadcast %7 : vector<1x32xf32> to vector<16x32xf32>
    %26 = arith.mulf %24, %25 : vector<16x32xf32>
    %27 = vector.broadcast %8 : vector<1x32xf32> to vector<16x32xf32>
    %28 = arith.addf %26, %27 : vector<16x32xf32>
    %c0_10 = arith.constant 0 : index
    %c0_11 = arith.constant 0 : index
    %29 = vector.load %arg2[%c0_10, %c0_11] : memref<2x8xf32, #tpu.memory_space<vmem>>, vector<2x8xf32>
    %30 = vector.shape_cast %29 : vector<2x8xf32> to vector<2x1x8xf32>
    %31 = vector.shape_cast %30 : vector<2x1x8xf32> to vector<2x1x8xf32>
    %32 = vector.broadcast %31 : vector<2x1x8xf32> to vector<2x8x8xf32>
    %c0_12 = arith.constant 0 : index
    %c0_13 = arith.constant 0 : index
    %c0_14 = arith.constant 0 : index
    %33 = vector.load %arg4[%c0_12, %c0_13, %c0_14] : memref<5x32x128xf32, #tpu.memory_space<vmem>>, vector<1x32x128xf32>
    %34 = vector.shape_cast %33 : vector<1x32x128xf32> to vector<32x128xf32>
    %cst_15 = arith.constant dense<0.000000e+00> : vector<16x128xf32>
    %35 = tpu.matmul %28, %34, %cst_15 {dimension_numbers = #tpu.dot_dimension_numbers<[1], [0], [0], [1], [0, 0, 1, 1], [], []>} : vector<16x32xf32>, vector<32x128xf32>, vector<16x128xf32> -> vector<16x128xf32>
    %c4 = arith.constant 4 : index
    %c0_16 = arith.constant 0 : index
    %36 = vector.load %arg3[%c4, %c0_16] : memref<24x128xf32, #tpu.memory_space<vmem>>, vector<1x128xf32>
    %37 = vector.broadcast %36 : vector<1x128xf32> to vector<16x128xf32>
    %38 = arith.addf %35, %37 : vector<16x128xf32>
    %39 = vector.extract_strided_slice %38 {offsets = [0, 0], sizes = [16, 32], strides = [1, 1]} : vector<16x128xf32> to vector<16x32xf32>
    %40 = vector.shape_cast %39 : vector<16x32xf32> to vector<2x8x32xf32>
    %41 = vector.extract_strided_slice %38 {offsets = [0, 32], sizes = [16, 32], strides = [1, 1]} : vector<16x128xf32> to vector<16x32xf32>
    %42 = vector.shape_cast %41 : vector<16x32xf32> to vector<2x8x32xf32>
    %43 = vector.extract_strided_slice %38 {offsets = [0, 64], sizes = [16, 32], strides = [1, 1]} : vector<16x128xf32> to vector<16x32xf32>
    %44 = vector.shape_cast %43 : vector<16x32xf32> to vector<2x8x32xf32>
    %c0_17 = arith.constant 0 : index
    %c0_18 = arith.constant 0 : index
    %c0_19 = arith.constant 0 : index
    %45 = vector.load %arg5[%c0_17, %c0_18, %c0_19] : memref<3x32x32xf32, #tpu.memory_space<vmem>>, vector<1x32x32xf32>
    %46 = vector.shape_cast %45 : vector<1x32x32xf32> to vector<32x32xf32>
    %47 = vector.extract_strided_slice %40 {offsets = [0, 0, 0], sizes = [2, 8, 8], strides = [1, 1, 1]} : vector<2x8x32xf32> to vector<2x8x8xf32>
    %48 = vector.extract_strided_slice %42 {offsets = [0, 0, 0], sizes = [2, 8, 8], strides = [1, 1, 1]} : vector<2x8x32xf32> to vector<2x8x8xf32>
    "tpu.trace_start"() <{level = 10 : i32, message = "bqd,bkd->bqk"}> : () -> ()
    %cst_20 = arith.constant dense<0.000000e+00> : vector<2x8x8xf32>
    %49 = tpu.matmul %47, %48, %cst_20 {dimension_numbers = #tpu.dot_dimension_numbers<[2], [2], [1], [1], [0, 0, 0, 1, 1, 1], [0], [0]>} : vector<2x8x8xf32>, vector<2x8x8xf32>, vector<2x8x8xf32> -> vector<2x8x8xf32>
    "tpu.trace_stop"() : () -> ()
    %50 = arith.addf %49, %32 : vector<2x8x8xf32>
    %cst_21 = arith.constant dense<0xFF800000> : vector<2x8xf32>
    %51 = vector.multi_reduction <maximumf>, %50, %cst_21 [2] : vector<2x8x8xf32> to vector<2x8xf32>
    %52 = vector.shape_cast %51 : vector<2x8xf32> to vector<2x8x1xf32>
    %53 = vector.broadcast %52 : vector<2x8x1xf32> to vector<2x8x8xf32>
    %54 = arith.subf %50, %53 : vector<2x8x8xf32>
    %55 = math.exp %54 : vector<2x8x8xf32>
    %cst_22 = arith.constant dense<0.000000e+00> : vector<2x8xf32>
    %56 = vector.multi_reduction <add>, %55, %cst_22 [2] : vector<2x8x8xf32> to vector<2x8xf32>
    %57 = vector.shape_cast %56 : vector<2x8xf32> to vector<2x8x1xf32>
    %58 = tpu.reciprocal %57 {approx = true} : vector<2x8x1xf32> -> vector<2x8x1xf32>
    %59 = vector.broadcast %58 : vector<2x8x1xf32> to vector<2x8x8xf32>
    %60 = arith.mulf %55, %59 : vector<2x8x8xf32>
    %61 = vector.extract_strided_slice %44 {offsets = [0, 0, 0], sizes = [2, 8, 8], strides = [1, 1, 1]} : vector<2x8x32xf32> to vector<2x8x8xf32>
    "tpu.trace_start"() <{level = 10 : i32, message = "bqk,bkd->bqd"}> : () -> ()
    %cst_23 = arith.constant dense<0.000000e+00> : vector<2x8x8xf32>
    %62 = tpu.matmul %60, %61, %cst_23 {dimension_numbers = #tpu.dot_dimension_numbers<[2], [1], [1], [2], [0, 0, 0, 1, 1, 2], [0], [0]>} : vector<2x8x8xf32>, vector<2x8x8xf32>, vector<2x8x8xf32> -> vector<2x8x8xf32>
    "tpu.trace_stop"() : () -> ()
    %63 = vector.shape_cast %62 : vector<2x8x8xf32> to vector<16x8xf32>
    %64 = vector.extract_strided_slice %46 {offsets = [0, 0], sizes = [8, 32], strides = [1, 1]} : vector<32x32xf32> to vector<8x32xf32>
    %cst_24 = arith.constant dense<0.000000e+00> : vector<16x32xf32>
    %65 = tpu.matmul %63, %64, %cst_24 {dimension_numbers = #tpu.dot_dimension_numbers<[1], [0], [0], [1], [0, 0, 1, 1], [], []>} : vector<16x8xf32>, vector<8x32xf32>, vector<16x32xf32> -> vector<16x32xf32>
    %66 = vector.extract_strided_slice %40 {offsets = [0, 0, 8], sizes = [2, 8, 8], strides = [1, 1, 1]} : vector<2x8x32xf32> to vector<2x8x8xf32>
    %67 = vector.extract_strided_slice %42 {offsets = [0, 0, 8], sizes = [2, 8, 8], strides = [1, 1, 1]} : vector<2x8x32xf32> to vector<2x8x8xf32>
    "tpu.trace_start"() <{level = 10 : i32, message = "bqd,bkd->bqk"}> : () -> ()
    %cst_25 = arith.constant dense<0.000000e+00> : vector<2x8x8xf32>
    %68 = tpu.matmul %66, %67, %cst_25 {dimension_numbers = #tpu.dot_dimension_numbers<[2], [2], [1], [1], [0, 0, 0, 1, 1, 1], [0], [0]>} : vector<2x8x8xf32>, vector<2x8x8xf32>, vector<2x8x8xf32> -> vector<2x8x8xf32>
    "tpu.trace_stop"() : () -> ()
    %69 = arith.addf %68, %32 : vector<2x8x8xf32>
    %cst_26 = arith.constant dense<0xFF800000> : vector<2x8xf32>
    %70 = vector.multi_reduction <maximumf>, %69, %cst_26 [2] : vector<2x8x8xf32> to vector<2x8xf32>
    %71 = vector.shape_cast %70 : vector<2x8xf32> to vector<2x8x1xf32>
    %72 = vector.broadcast %71 : vector<2x8x1xf32> to vector<2x8x8xf32>
    %73 = arith.subf %69, %72 : vector<2x8x8xf32>
    %74 = math.exp %73 : vector<2x8x8xf32>
    %cst_27 = arith.constant dense<0.000000e+00> : vector<2x8xf32>
    %75 = vector.multi_reduction <add>, %74, %cst_27 [2] : vector<2x8x8xf32> to vector<2x8xf32>
    %76 = vector.shape_cast %75 : vector<2x8xf32> to vector<2x8x1xf32>
    %77 = tpu.reciprocal %76 {approx = true} : vector<2x8x1xf32> -> vector<2x8x1xf32>
    %78 = vector.broadcast %77 : vector<2x8x1xf32> to vector<2x8x8xf32>
    %79 = arith.mulf %74, %78 : vector<2x8x8xf32>
    %80 = vector.extract_strided_slice %44 {offsets = [0, 0, 8], sizes = [2, 8, 8], strides = [1, 1, 1]} : vector<2x8x32xf32> to vector<2x8x8xf32>
    "tpu.trace_start"() <{level = 10 : i32, message = "bqk,bkd->bqd"}> : () -> ()
    %cst_28 = arith.constant dense<0.000000e+00> : vector<2x8x8xf32>
    %81 = tpu.matmul %79, %80, %cst_28 {dimension_numbers = #tpu.dot_dimension_numbers<[2], [1], [1], [2], [0, 0, 0, 1, 1, 2], [0], [0]>} : vector<2x8x8xf32>, vector<2x8x8xf32>, vector<2x8x8xf32> -> vector<2x8x8xf32>
    "tpu.trace_stop"() : () -> ()
    %82 = vector.shape_cast %81 : vector<2x8x8xf32> to vector<16x8xf32>
    %83 = vector.extract_strided_slice %46 {offsets = [8, 0], sizes = [8, 32], strides = [1, 1]} : vector<32x32xf32> to vector<8x32xf32>
    %cst_29 = arith.constant dense<0.000000e+00> : vector<16x32xf32>
    %84 = tpu.matmul %82, %83, %cst_29 {dimension_numbers = #tpu.dot_dimension_numbers<[1], [0], [0], [1], [0, 0, 1, 1], [], []>} : vector<16x8xf32>, vector<8x32xf32>, vector<16x32xf32> -> vector<16x32xf32>
    %85 = arith.addf %65, %84 : vector<16x32xf32>
    %86 = vector.extract_strided_slice %40 {offsets = [0, 0, 16], sizes = [2, 8, 8], strides = [1, 1, 1]} : vector<2x8x32xf32> to vector<2x8x8xf32>
    %87 = vector.extract_strided_slice %42 {offsets = [0, 0, 16], sizes = [2, 8, 8], strides = [1, 1, 1]} : vector<2x8x32xf32> to vector<2x8x8xf32>
    "tpu.trace_start"() <{level = 10 : i32, message = "bqd,bkd->bqk"}> : () -> ()
    %cst_30 = arith.constant dense<0.000000e+00> : vector<2x8x8xf32>
    %88 = tpu.matmul %86, %87, %cst_30 {dimension_numbers = #tpu.dot_dimension_numbers<[2], [2], [1], [1], [0, 0, 0, 1, 1, 1], [0], [0]>} : vector<2x8x8xf32>, vector<2x8x8xf32>, vector<2x8x8xf32> -> vector<2x8x8xf32>
    "tpu.trace_stop"() : () -> ()
    %89 = arith.addf %88, %32 : vector<2x8x8xf32>
    %cst_31 = arith.constant dense<0xFF800000> : vector<2x8xf32>
    %90 = vector.multi_reduction <maximumf>, %89, %cst_31 [2] : vector<2x8x8xf32> to vector<2x8xf32>
    %91 = vector.shape_cast %90 : vector<2x8xf32> to vector<2x8x1xf32>
    %92 = vector.broadcast %91 : vector<2x8x1xf32> to vector<2x8x8xf32>
    %93 = arith.subf %89, %92 : vector<2x8x8xf32>
    %94 = math.exp %93 : vector<2x8x8xf32>
    %cst_32 = arith.constant dense<0.000000e+00> : vector<2x8xf32>
    %95 = vector.multi_reduction <add>, %94, %cst_32 [2] : vector<2x8x8xf32> to vector<2x8xf32>
    %96 = vector.shape_cast %95 : vector<2x8xf32> to vector<2x8x1xf32>
    %97 = tpu.reciprocal %96 {approx = true} : vector<2x8x1xf32> -> vector<2x8x1xf32>
    %98 = vector.broadcast %97 : vector<2x8x1xf32> to vector<2x8x8xf32>
    %99 = arith.mulf %94, %98 : vector<2x8x8xf32>
    %100 = vector.extract_strided_slice %44 {offsets = [0, 0, 16], sizes = [2, 8, 8], strides = [1, 1, 1]} : vector<2x8x32xf32> to vector<2x8x8xf32>
    "tpu.trace_start"() <{level = 10 : i32, message = "bqk,bkd->bqd"}> : () -> ()
    %cst_33 = arith.constant dense<0.000000e+00> : vector<2x8x8xf32>
    %101 = tpu.matmul %99, %100, %cst_33 {dimension_numbers = #tpu.dot_dimension_numbers<[2], [1], [1], [2], [0, 0, 0, 1, 1, 2], [0], [0]>} : vector<2x8x8xf32>, vector<2x8x8xf32>, vector<2x8x8xf32> -> vector<2x8x8xf32>
    "tpu.trace_stop"() : () -> ()
    %102 = vector.shape_cast %101 : vector<2x8x8xf32> to vector<16x8xf32>
    %103 = vector.extract_strided_slice %46 {offsets = [16, 0], sizes = [8, 32], strides = [1, 1]} : vector<32x32xf32> to vector<8x32xf32>
    %cst_34 = arith.constant dense<0.000000e+00> : vector<16x32xf32>
    %104 = tpu.matmul %102, %103, %cst_34 {dimension_numbers = #tpu.dot_dimension_numbers<[1], [0], [0], [1], [0, 0, 1, 1], [], []>} : vector<16x8xf32>, vector<8x32xf32>, vector<16x32xf32> -> vector<16x32xf32>
    %105 = arith.addf %85, %104 : vector<16x32xf32>
    %106 = vector.extract_strided_slice %40 {offsets = [0, 0, 24], sizes = [2, 8, 8], strides = [1, 1, 1]} : vector<2x8x32xf32> to vector<2x8x8xf32>
    %107 = vector.extract_strided_slice %42 {offsets = [0, 0, 24], sizes = [2, 8, 8], strides = [1, 1, 1]} : vector<2x8x32xf32> to vector<2x8x8xf32>
    "tpu.trace_start"() <{level = 10 : i32, message = "bqd,bkd->bqk"}> : () -> ()
    %cst_35 = arith.constant dense<0.000000e+00> : vector<2x8x8xf32>
    %108 = tpu.matmul %106, %107, %cst_35 {dimension_numbers = #tpu.dot_dimension_numbers<[2], [2], [1], [1], [0, 0, 0, 1, 1, 1], [0], [0]>} : vector<2x8x8xf32>, vector<2x8x8xf32>, vector<2x8x8xf32> -> vector<2x8x8xf32>
    "tpu.trace_stop"() : () -> ()
    %109 = arith.addf %108, %32 : vector<2x8x8xf32>
    %cst_36 = arith.constant dense<0xFF800000> : vector<2x8xf32>
    %110 = vector.multi_reduction <maximumf>, %109, %cst_36 [2] : vector<2x8x8xf32> to vector<2x8xf32>
    %111 = vector.shape_cast %110 : vector<2x8xf32> to vector<2x8x1xf32>
    %112 = vector.broadcast %111 : vector<2x8x1xf32> to vector<2x8x8xf32>
    %113 = arith.subf %109, %112 : vector<2x8x8xf32>
    %114 = math.exp %113 : vector<2x8x8xf32>
    %cst_37 = arith.constant dense<0.000000e+00> : vector<2x8xf32>
    %115 = vector.multi_reduction <add>, %114, %cst_37 [2] : vector<2x8x8xf32> to vector<2x8xf32>
    %116 = vector.shape_cast %115 : vector<2x8xf32> to vector<2x8x1xf32>
    %117 = tpu.reciprocal %116 {approx = true} : vector<2x8x1xf32> -> vector<2x8x1xf32>
    %118 = vector.broadcast %117 : vector<2x8x1xf32> to vector<2x8x8xf32>
    %119 = arith.mulf %114, %118 : vector<2x8x8xf32>
    %120 = vector.extract_strided_slice %44 {offsets = [0, 0, 24], sizes = [2, 8, 8], strides = [1, 1, 1]} : vector<2x8x32xf32> to vector<2x8x8xf32>
    "tpu.trace_start"() <{level = 10 : i32, message = "bqk,bkd->bqd"}> : () -> ()
    %cst_38 = arith.constant dense<0.000000e+00> : vector<2x8x8xf32>
    %121 = tpu.matmul %119, %120, %cst_38 {dimension_numbers = #tpu.dot_dimension_numbers<[2], [1], [1], [2], [0, 0, 0, 1, 1, 2], [0], [0]>} : vector<2x8x8xf32>, vector<2x8x8xf32>, vector<2x8x8xf32> -> vector<2x8x8xf32>
    "tpu.trace_stop"() : () -> ()
    %122 = vector.shape_cast %121 : vector<2x8x8xf32> to vector<16x8xf32>
    %123 = vector.extract_strided_slice %46 {offsets = [24, 0], sizes = [8, 32], strides = [1, 1]} : vector<32x32xf32> to vector<8x32xf32>
    %cst_39 = arith.constant dense<0.000000e+00> : vector<16x32xf32>
    %124 = tpu.matmul %122, %123, %cst_39 {dimension_numbers = #tpu.dot_dimension_numbers<[1], [0], [0], [1], [0, 0, 1, 1], [], []>} : vector<16x8xf32>, vector<8x32xf32>, vector<16x32xf32> -> vector<16x32xf32>
    %125 = arith.addf %105, %124 : vector<16x32xf32>
    %c5 = arith.constant 5 : index
    %c0_40 = arith.constant 0 : index
    %126 = vector.load %arg3[%c5, %c0_40] : memref<24x128xf32, #tpu.memory_space<vmem>>, vector<1x32xf32>
    %127 = vector.broadcast %126 : vector<1x32xf32> to vector<16x32xf32>
    %128 = arith.addf %125, %127 : vector<16x32xf32>
    %129 = arith.addf %128, %28 : vector<16x32xf32>
    %c6 = arith.constant 6 : index
    %c0_41 = arith.constant 0 : index
    %130 = vector.load %arg3[%c6, %c0_41] : memref<24x128xf32, #tpu.memory_space<vmem>>, vector<1x32xf32>
    %c7 = arith.constant 7 : index
    %c0_42 = arith.constant 0 : index
    %131 = vector.load %arg3[%c7, %c0_42] : memref<24x128xf32, #tpu.memory_space<vmem>>, vector<1x32xf32>
    %cst_43 = arith.constant dense<0.000000e+00> : vector<16xf32>
    %132 = vector.multi_reduction <add>, %129, %cst_43 [1] : vector<16x32xf32> to vector<16xf32>
    %133 = vector.shape_cast %132 : vector<16xf32> to vector<16x1xf32>
    %cst_44 = arith.constant 3.200000e+01 : f32
    %134 = vector.broadcast %cst_44 : f32 to vector<16x1xf32>
    %135 = arith.divf %133, %134 : vector<16x1xf32>
    %136 = vector.broadcast %135 : vector<16x1xf32> to vector<16x32xf32>
    %137 = arith.subf %129, %136 : vector<16x32xf32>
    %138 = arith.mulf %137, %137 : vector<16x32xf32>
    %cst_45 = arith.constant dense<0.000000e+00> : vector<16xf32>
    %139 = vector.multi_reduction <add>, %138, %cst_45 [1] : vector<16x32xf32> to vector<16xf32>
    %140 = vector.shape_cast %139 : vector<16xf32> to vector<16x1xf32>
    %cst_46 = arith.constant 3.200000e+01 : f32
    %141 = vector.broadcast %cst_46 : f32 to vector<16x1xf32>
    %142 = arith.divf %140, %141 : vector<16x1xf32>
    %cst_47 = arith.constant 9.99999996E-13 : f32
    %143 = vector.broadcast %cst_47 : f32 to vector<16x1xf32>
    %144 = arith.addf %142, %143 : vector<16x1xf32>
    %145 = math.rsqrt %144 : vector<16x1xf32>
    %146 = vector.broadcast %145 : vector<16x1xf32> to vector<16x32xf32>
    %147 = arith.mulf %137, %146 : vector<16x32xf32>
    %148 = vector.broadcast %130 : vector<1x32xf32> to vector<16x32xf32>
    %149 = arith.mulf %147, %148 : vector<16x32xf32>
    %150 = vector.broadcast %131 : vector<1x32xf32> to vector<16x32xf32>
    %151 = arith.addf %149, %150 : vector<16x32xf32>
    %c2 = arith.constant 2 : index
    %c0_48 = arith.constant 0 : index
    %c0_49 = arith.constant 0 : index
    %152 = vector.load %arg4[%c2, %c0_48, %c0_49] : memref<5x32x128xf32, #tpu.memory_space<vmem>>, vector<1x32x128xf32>
    %153 = vector.shape_cast %152 : vector<1x32x128xf32> to vector<32x128xf32>
    %cst_50 = arith.constant dense<0.000000e+00> : vector<16x128xf32>
    %154 = tpu.matmul %151, %153, %cst_50 {dimension_numbers = #tpu.dot_dimension_numbers<[1], [0], [0], [1], [0, 0, 1, 1], [], []>} : vector<16x32xf32>, vector<32x128xf32>, vector<16x128xf32> -> vector<16x128xf32>
    %c8 = arith.constant 8 : index
    %c0_51 = arith.constant 0 : index
    %155 = vector.load %arg3[%c8, %c0_51] : memref<24x128xf32, #tpu.memory_space<vmem>>, vector<1x128xf32>
    %156 = vector.broadcast %155 : vector<1x128xf32> to vector<16x128xf32>
    %157 = arith.addf %154, %156 : vector<16x128xf32>
    %cst_52 = arith.constant 5.000000e-01 : f32
    %158 = vector.broadcast %cst_52 : f32 to vector<16x128xf32>
    %159 = arith.mulf %158, %157 : vector<16x128xf32>
    %cst_53 = arith.constant 4.471500e-02 : f32
    %160 = vector.broadcast %cst_53 : f32 to vector<16x128xf32>
    %161 = arith.mulf %160, %157 : vector<16x128xf32>
    %162 = arith.mulf %161, %157 : vector<16x128xf32>
    %163 = arith.mulf %162, %157 : vector<16x128xf32>
    %164 = arith.addf %157, %163 : vector<16x128xf32>
    %cst_54 = arith.constant 0.797884583 : f32
    %165 = vector.broadcast %cst_54 : f32 to vector<16x128xf32>
    %166 = arith.mulf %165, %164 : vector<16x128xf32>
    %167 = math.tanh %166 : vector<16x128xf32>
    %cst_55 = arith.constant 1.000000e+00 : f32
    %168 = vector.broadcast %cst_55 : f32 to vector<16x128xf32>
    %169 = arith.addf %168, %167 : vector<16x128xf32>
    %170 = arith.mulf %159, %169 : vector<16x128xf32>
    %c0_56 = arith.constant 0 : index
    %c0_57 = arith.constant 0 : index
    %c0_58 = arith.constant 0 : index
    %171 = vector.load %arg6[%c0_56, %c0_57, %c0_58] : memref<2x128x32xf32, #tpu.memory_space<vmem>>, vector<1x128x32xf32>
    %172 = vector.shape_cast %171 : vector<1x128x32xf32> to vector<128x32xf32>
    %cst_59 = arith.constant dense<0.000000e+00> : vector<16x32xf32>
    %173 = tpu.matmul %170, %172, %cst_59 {dimension_numbers = #tpu.dot_dimension_numbers<[1], [0], [0], [1], [0, 0, 1, 1], [], []>} : vector<16x128xf32>, vector<128x32xf32>, vector<16x32xf32> -> vector<16x32xf32>
    %c9 = arith.constant 9 : index
    %c0_60 = arith.constant 0 : index
    %174 = vector.load %arg3[%c9, %c0_60] : memref<24x128xf32, #tpu.memory_space<vmem>>, vector<1x32xf32>
    %175 = vector.broadcast %174 : vector<1x32xf32> to vector<16x32xf32>
    %176 = arith.addf %173, %175 : vector<16x32xf32>
    %177 = arith.addf %176, %151 : vector<16x32xf32>
    %c10 = arith.constant 10 : index
    %c0_61 = arith.constant 0 : index
    %178 = vector.load %arg3[%c10, %c0_61] : memref<24x128xf32, #tpu.memory_space<vmem>>, vector<1x32xf32>
    %c11 = arith.constant 11 : index
    %c0_62 = arith.constant 0 : index
    %179 = vector.load %arg3[%c11, %c0_62] : memref<24x128xf32, #tpu.memory_space<vmem>>, vector<1x32xf32>
    %cst_63 = arith.constant dense<0.000000e+00> : vector<16xf32>
    %180 = vector.multi_reduction <add>, %177, %cst_63 [1] : vector<16x32xf32> to vector<16xf32>
    %181 = vector.shape_cast %180 : vector<16xf32> to vector<16x1xf32>
    %cst_64 = arith.constant 3.200000e+01 : f32
    %182 = vector.broadcast %cst_64 : f32 to vector<16x1xf32>
    %183 = arith.divf %181, %182 : vector<16x1xf32>
    %184 = vector.broadcast %183 : vector<16x1xf32> to vector<16x32xf32>
    %185 = arith.subf %177, %184 : vector<16x32xf32>
    %186 = arith.mulf %185, %185 : vector<16x32xf32>
    %cst_65 = arith.constant dense<0.000000e+00> : vector<16xf32>
    %187 = vector.multi_reduction <add>, %186, %cst_65 [1] : vector<16x32xf32> to vector<16xf32>
    %188 = vector.shape_cast %187 : vector<16xf32> to vector<16x1xf32>
    %cst_66 = arith.constant 3.200000e+01 : f32
    %189 = vector.broadcast %cst_66 : f32 to vector<16x1xf32>
    %190 = arith.divf %188, %189 : vector<16x1xf32>
    %cst_67 = arith.constant 9.99999996E-13 : f32
    %191 = vector.broadcast %cst_67 : f32 to vector<16x1xf32>
    %192 = arith.addf %190, %191 : vector<16x1xf32>
    %193 = math.rsqrt %192 : vector<16x1xf32>
    %194 = vector.broadcast %193 : vector<16x1xf32> to vector<16x32xf32>
    %195 = arith.mulf %185, %194 : vector<16x32xf32>
    %196 = vector.broadcast %178 : vector<1x32xf32> to vector<16x32xf32>
    %197 = arith.mulf %195, %196 : vector<16x32xf32>
    %198 = vector.broadcast %179 : vector<1x32xf32> to vector<16x32xf32>
    %199 = arith.addf %197, %198 : vector<16x32xf32>
    %c1_68 = arith.constant 1 : index
    %c0_69 = arith.constant 0 : index
    %c0_70 = arith.constant 0 : index
    %200 = vector.load %arg4[%c1_68, %c0_69, %c0_70] : memref<5x32x128xf32, #tpu.memory_space<vmem>>, vector<1x32x128xf32>
    %201 = vector.shape_cast %200 : vector<1x32x128xf32> to vector<32x128xf32>
    %cst_71 = arith.constant dense<0.000000e+00> : vector<16x128xf32>
    %202 = tpu.matmul %199, %201, %cst_71 {dimension_numbers = #tpu.dot_dimension_numbers<[1], [0], [0], [1], [0, 0, 1, 1], [], []>} : vector<16x32xf32>, vector<32x128xf32>, vector<16x128xf32> -> vector<16x128xf32>
    %c12 = arith.constant 12 : index
    %c0_72 = arith.constant 0 : index
    %203 = vector.load %arg3[%c12, %c0_72] : memref<24x128xf32, #tpu.memory_space<vmem>>, vector<1x128xf32>
    %204 = vector.broadcast %203 : vector<1x128xf32> to vector<16x128xf32>
    %205 = arith.addf %202, %204 : vector<16x128xf32>
    %206 = vector.extract_strided_slice %205 {offsets = [0, 0], sizes = [16, 32], strides = [1, 1]} : vector<16x128xf32> to vector<16x32xf32>
    %207 = vector.shape_cast %206 : vector<16x32xf32> to vector<2x8x32xf32>
    %208 = vector.extract_strided_slice %205 {offsets = [0, 32], sizes = [16, 32], strides = [1, 1]} : vector<16x128xf32> to vector<16x32xf32>
    %209 = vector.shape_cast %208 : vector<16x32xf32> to vector<2x8x32xf32>
    %210 = vector.extract_strided_slice %205 {offsets = [0, 64], sizes = [16, 32], strides = [1, 1]} : vector<16x128xf32> to vector<16x32xf32>
    %211 = vector.shape_cast %210 : vector<16x32xf32> to vector<2x8x32xf32>
    %c1_73 = arith.constant 1 : index
    %c0_74 = arith.constant 0 : index
    %c0_75 = arith.constant 0 : index
    %212 = vector.load %arg5[%c1_73, %c0_74, %c0_75] : memref<3x32x32xf32, #tpu.memory_space<vmem>>, vector<1x32x32xf32>
    %213 = vector.shape_cast %212 : vector<1x32x32xf32> to vector<32x32xf32>
    %214 = vector.extract_strided_slice %207 {offsets = [0, 0, 0], sizes = [2, 8, 8], strides = [1, 1, 1]} : vector<2x8x32xf32> to vector<2x8x8xf32>
    %215 = vector.extract_strided_slice %209 {offsets = [0, 0, 0], sizes = [2, 8, 8], strides = [1, 1, 1]} : vector<2x8x32xf32> to vector<2x8x8xf32>
    "tpu.trace_start"() <{level = 10 : i32, message = "bqd,bkd->bqk"}> : () -> ()
    %cst_76 = arith.constant dense<0.000000e+00> : vector<2x8x8xf32>
    %216 = tpu.matmul %214, %215, %cst_76 {dimension_numbers = #tpu.dot_dimension_numbers<[2], [2], [1], [1], [0, 0, 0, 1, 1, 1], [0], [0]>} : vector<2x8x8xf32>, vector<2x8x8xf32>, vector<2x8x8xf32> -> vector<2x8x8xf32>
    "tpu.trace_stop"() : () -> ()
    %217 = arith.addf %216, %32 : vector<2x8x8xf32>
    %cst_77 = arith.constant dense<0xFF800000> : vector<2x8xf32>
    %218 = vector.multi_reduction <maximumf>, %217, %cst_77 [2] : vector<2x8x8xf32> to vector<2x8xf32>
    %219 = vector.shape_cast %218 : vector<2x8xf32> to vector<2x8x1xf32>
    %220 = vector.broadcast %219 : vector<2x8x1xf32> to vector<2x8x8xf32>
    %221 = arith.subf %217, %220 : vector<2x8x8xf32>
    %222 = math.exp %221 : vector<2x8x8xf32>
    %cst_78 = arith.constant dense<0.000000e+00> : vector<2x8xf32>
    %223 = vector.multi_reduction <add>, %222, %cst_78 [2] : vector<2x8x8xf32> to vector<2x8xf32>
    %224 = vector.shape_cast %223 : vector<2x8xf32> to vector<2x8x1xf32>
    %225 = tpu.reciprocal %224 {approx = true} : vector<2x8x1xf32> -> vector<2x8x1xf32>
    %226 = vector.broadcast %225 : vector<2x8x1xf32> to vector<2x8x8xf32>
    %227 = arith.mulf %222, %226 : vector<2x8x8xf32>
    %228 = vector.extract_strided_slice %211 {offsets = [0, 0, 0], sizes = [2, 8, 8], strides = [1, 1, 1]} : vector<2x8x32xf32> to vector<2x8x8xf32>
    "tpu.trace_start"() <{level = 10 : i32, message = "bqk,bkd->bqd"}> : () -> ()
    %cst_79 = arith.constant dense<0.000000e+00> : vector<2x8x8xf32>
    %229 = tpu.matmul %227, %228, %cst_79 {dimension_numbers = #tpu.dot_dimension_numbers<[2], [1], [1], [2], [0, 0, 0, 1, 1, 2], [0], [0]>} : vector<2x8x8xf32>, vector<2x8x8xf32>, vector<2x8x8xf32> -> vector<2x8x8xf32>
    "tpu.trace_stop"() : () -> ()
    %230 = vector.shape_cast %229 : vector<2x8x8xf32> to vector<16x8xf32>
    %231 = vector.extract_strided_slice %213 {offsets = [0, 0], sizes = [8, 32], strides = [1, 1]} : vector<32x32xf32> to vector<8x32xf32>
    %cst_80 = arith.constant dense<0.000000e+00> : vector<16x32xf32>
    %232 = tpu.matmul %230, %231, %cst_80 {dimension_numbers = #tpu.dot_dimension_numbers<[1], [0], [0], [1], [0, 0, 1, 1], [], []>} : vector<16x8xf32>, vector<8x32xf32>, vector<16x32xf32> -> vector<16x32xf32>
    %233 = vector.extract_strided_slice %207 {offsets = [0, 0, 8], sizes = [2, 8, 8], strides = [1, 1, 1]} : vector<2x8x32xf32> to vector<2x8x8xf32>
    %234 = vector.extract_strided_slice %209 {offsets = [0, 0, 8], sizes = [2, 8, 8], strides = [1, 1, 1]} : vector<2x8x32xf32> to vector<2x8x8xf32>
    "tpu.trace_start"() <{level = 10 : i32, message = "bqd,bkd->bqk"}> : () -> ()
    %cst_81 = arith.constant dense<0.000000e+00> : vector<2x8x8xf32>
    %235 = tpu.matmul %233, %234, %cst_81 {dimension_numbers = #tpu.dot_dimension_numbers<[2], [2], [1], [1], [0, 0, 0, 1, 1, 1], [0], [0]>} : vector<2x8x8xf32>, vector<2x8x8xf32>, vector<2x8x8xf32> -> vector<2x8x8xf32>
    "tpu.trace_stop"() : () -> ()
    %236 = arith.addf %235, %32 : vector<2x8x8xf32>
    %cst_82 = arith.constant dense<0xFF800000> : vector<2x8xf32>
    %237 = vector.multi_reduction <maximumf>, %236, %cst_82 [2] : vector<2x8x8xf32> to vector<2x8xf32>
    %238 = vector.shape_cast %237 : vector<2x8xf32> to vector<2x8x1xf32>
    %239 = vector.broadcast %238 : vector<2x8x1xf32> to vector<2x8x8xf32>
    %240 = arith.subf %236, %239 : vector<2x8x8xf32>
    %241 = math.exp %240 : vector<2x8x8xf32>
    %cst_83 = arith.constant dense<0.000000e+00> : vector<2x8xf32>
    %242 = vector.multi_reduction <add>, %241, %cst_83 [2] : vector<2x8x8xf32> to vector<2x8xf32>
    %243 = vector.shape_cast %242 : vector<2x8xf32> to vector<2x8x1xf32>
    %244 = tpu.reciprocal %243 {approx = true} : vector<2x8x1xf32> -> vector<2x8x1xf32>
    %245 = vector.broadcast %244 : vector<2x8x1xf32> to vector<2x8x8xf32>
    %246 = arith.mulf %241, %245 : vector<2x8x8xf32>
    %247 = vector.extract_strided_slice %211 {offsets = [0, 0, 8], sizes = [2, 8, 8], strides = [1, 1, 1]} : vector<2x8x32xf32> to vector<2x8x8xf32>
    "tpu.trace_start"() <{level = 10 : i32, message = "bqk,bkd->bqd"}> : () -> ()
    %cst_84 = arith.constant dense<0.000000e+00> : vector<2x8x8xf32>
    %248 = tpu.matmul %246, %247, %cst_84 {dimension_numbers = #tpu.dot_dimension_numbers<[2], [1], [1], [2], [0, 0, 0, 1, 1, 2], [0], [0]>} : vector<2x8x8xf32>, vector<2x8x8xf32>, vector<2x8x8xf32> -> vector<2x8x8xf32>
    "tpu.trace_stop"() : () -> ()
    %249 = vector.shape_cast %248 : vector<2x8x8xf32> to vector<16x8xf32>
    %250 = vector.extract_strided_slice %213 {offsets = [8, 0], sizes = [8, 32], strides = [1, 1]} : vector<32x32xf32> to vector<8x32xf32>
    %cst_85 = arith.constant dense<0.000000e+00> : vector<16x32xf32>
    %251 = tpu.matmul %249, %250, %cst_85 {dimension_numbers = #tpu.dot_dimension_numbers<[1], [0], [0], [1], [0, 0, 1, 1], [], []>} : vector<16x8xf32>, vector<8x32xf32>, vector<16x32xf32> -> vector<16x32xf32>
    %252 = arith.addf %232, %251 : vector<16x32xf32>
    %253 = vector.extract_strided_slice %207 {offsets = [0, 0, 16], sizes = [2, 8, 8], strides = [1, 1, 1]} : vector<2x8x32xf32> to vector<2x8x8xf32>
    %254 = vector.extract_strided_slice %209 {offsets = [0, 0, 16], sizes = [2, 8, 8], strides = [1, 1, 1]} : vector<2x8x32xf32> to vector<2x8x8xf32>
    "tpu.trace_start"() <{level = 10 : i32, message = "bqd,bkd->bqk"}> : () -> ()
    %cst_86 = arith.constant dense<0.000000e+00> : vector<2x8x8xf32>
    %255 = tpu.matmul %253, %254, %cst_86 {dimension_numbers = #tpu.dot_dimension_numbers<[2], [2], [1], [1], [0, 0, 0, 1, 1, 1], [0], [0]>} : vector<2x8x8xf32>, vector<2x8x8xf32>, vector<2x8x8xf32> -> vector<2x8x8xf32>
    "tpu.trace_stop"() : () -> ()
    %256 = arith.addf %255, %32 : vector<2x8x8xf32>
    %cst_87 = arith.constant dense<0xFF800000> : vector<2x8xf32>
    %257 = vector.multi_reduction <maximumf>, %256, %cst_87 [2] : vector<2x8x8xf32> to vector<2x8xf32>
    %258 = vector.shape_cast %257 : vector<2x8xf32> to vector<2x8x1xf32>
    %259 = vector.broadcast %258 : vector<2x8x1xf32> to vector<2x8x8xf32>
    %260 = arith.subf %256, %259 : vector<2x8x8xf32>
    %261 = math.exp %260 : vector<2x8x8xf32>
    %cst_88 = arith.constant dense<0.000000e+00> : vector<2x8xf32>
    %262 = vector.multi_reduction <add>, %261, %cst_88 [2] : vector<2x8x8xf32> to vector<2x8xf32>
    %263 = vector.shape_cast %262 : vector<2x8xf32> to vector<2x8x1xf32>
    %264 = tpu.reciprocal %263 {approx = true} : vector<2x8x1xf32> -> vector<2x8x1xf32>
    %265 = vector.broadcast %264 : vector<2x8x1xf32> to vector<2x8x8xf32>
    %266 = arith.mulf %261, %265 : vector<2x8x8xf32>
    %267 = vector.extract_strided_slice %211 {offsets = [0, 0, 16], sizes = [2, 8, 8], strides = [1, 1, 1]} : vector<2x8x32xf32> to vector<2x8x8xf32>
    "tpu.trace_start"() <{level = 10 : i32, message = "bqk,bkd->bqd"}> : () -> ()
    %cst_89 = arith.constant dense<0.000000e+00> : vector<2x8x8xf32>
    %268 = tpu.matmul %266, %267, %cst_89 {dimension_numbers = #tpu.dot_dimension_numbers<[2], [1], [1], [2], [0, 0, 0, 1, 1, 2], [0], [0]>} : vector<2x8x8xf32>, vector<2x8x8xf32>, vector<2x8x8xf32> -> vector<2x8x8xf32>
    "tpu.trace_stop"() : () -> ()
    %269 = vector.shape_cast %268 : vector<2x8x8xf32> to vector<16x8xf32>
    %270 = vector.extract_strided_slice %213 {offsets = [16, 0], sizes = [8, 32], strides = [1, 1]} : vector<32x32xf32> to vector<8x32xf32>
    %cst_90 = arith.constant dense<0.000000e+00> : vector<16x32xf32>
    %271 = tpu.matmul %269, %270, %cst_90 {dimension_numbers = #tpu.dot_dimension_numbers<[1], [0], [0], [1], [0, 0, 1, 1], [], []>} : vector<16x8xf32>, vector<8x32xf32>, vector<16x32xf32> -> vector<16x32xf32>
    %272 = arith.addf %252, %271 : vector<16x32xf32>
    %273 = vector.extract_strided_slice %207 {offsets = [0, 0, 24], sizes = [2, 8, 8], strides = [1, 1, 1]} : vector<2x8x32xf32> to vector<2x8x8xf32>
    %274 = vector.extract_strided_slice %209 {offsets = [0, 0, 24], sizes = [2, 8, 8], strides = [1, 1, 1]} : vector<2x8x32xf32> to vector<2x8x8xf32>
    "tpu.trace_start"() <{level = 10 : i32, message = "bqd,bkd->bqk"}> : () -> ()
    %cst_91 = arith.constant dense<0.000000e+00> : vector<2x8x8xf32>
    %275 = tpu.matmul %273, %274, %cst_91 {dimension_numbers = #tpu.dot_dimension_numbers<[2], [2], [1], [1], [0, 0, 0, 1, 1, 1], [0], [0]>} : vector<2x8x8xf32>, vector<2x8x8xf32>, vector<2x8x8xf32> -> vector<2x8x8xf32>
    "tpu.trace_stop"() : () -> ()
    %276 = arith.addf %275, %32 : vector<2x8x8xf32>
    %cst_92 = arith.constant dense<0xFF800000> : vector<2x8xf32>
    %277 = vector.multi_reduction <maximumf>, %276, %cst_92 [2] : vector<2x8x8xf32> to vector<2x8xf32>
    %278 = vector.shape_cast %277 : vector<2x8xf32> to vector<2x8x1xf32>
    %279 = vector.broadcast %278 : vector<2x8x1xf32> to vector<2x8x8xf32>
    %280 = arith.subf %276, %279 : vector<2x8x8xf32>
    %281 = math.exp %280 : vector<2x8x8xf32>
    %cst_93 = arith.constant dense<0.000000e+00> : vector<2x8xf32>
    %282 = vector.multi_reduction <add>, %281, %cst_93 [2] : vector<2x8x8xf32> to vector<2x8xf32>
    %283 = vector.shape_cast %282 : vector<2x8xf32> to vector<2x8x1xf32>
    %284 = tpu.reciprocal %283 {approx = true} : vector<2x8x1xf32> -> vector<2x8x1xf32>
    %285 = vector.broadcast %284 : vector<2x8x1xf32> to vector<2x8x8xf32>
    %286 = arith.mulf %281, %285 : vector<2x8x8xf32>
    %287 = vector.extract_strided_slice %211 {offsets = [0, 0, 24], sizes = [2, 8, 8], strides = [1, 1, 1]} : vector<2x8x32xf32> to vector<2x8x8xf32>
    "tpu.trace_start"() <{level = 10 : i32, message = "bqk,bkd->bqd"}> : () -> ()
    %cst_94 = arith.constant dense<0.000000e+00> : vector<2x8x8xf32>
    %288 = tpu.matmul %286, %287, %cst_94 {dimension_numbers = #tpu.dot_dimension_numbers<[2], [1], [1], [2], [0, 0, 0, 1, 1, 2], [0], [0]>} : vector<2x8x8xf32>, vector<2x8x8xf32>, vector<2x8x8xf32> -> vector<2x8x8xf32>
    "tpu.trace_stop"() : () -> ()
    %289 = vector.shape_cast %288 : vector<2x8x8xf32> to vector<16x8xf32>
    %290 = vector.extract_strided_slice %213 {offsets = [24, 0], sizes = [8, 32], strides = [1, 1]} : vector<32x32xf32> to vector<8x32xf32>
    %cst_95 = arith.constant dense<0.000000e+00> : vector<16x32xf32>
    %291 = tpu.matmul %289, %290, %cst_95 {dimension_numbers = #tpu.dot_dimension_numbers<[1], [0], [0], [1], [0, 0, 1, 1], [], []>} : vector<16x8xf32>, vector<8x32xf32>, vector<16x32xf32> -> vector<16x32xf32>
    %292 = arith.addf %272, %291 : vector<16x32xf32>
    %c13 = arith.constant 13 : index
    %c0_96 = arith.constant 0 : index
    %293 = vector.load %arg3[%c13, %c0_96] : memref<24x128xf32, #tpu.memory_space<vmem>>, vector<1x32xf32>
    %294 = vector.broadcast %293 : vector<1x32xf32> to vector<16x32xf32>
    %295 = arith.addf %292, %294 : vector<16x32xf32>
    %296 = arith.addf %295, %199 : vector<16x32xf32>
    %c14 = arith.constant 14 : index
    %c0_97 = arith.constant 0 : index
    %297 = vector.load %arg3[%c14, %c0_97] : memref<24x128xf32, #tpu.memory_space<vmem>>, vector<1x32xf32>
    %c15 = arith.constant 15 : index
    %c0_98 = arith.constant 0 : index
    %298 = vector.load %arg3[%c15, %c0_98] : memref<24x128xf32, #tpu.memory_space<vmem>>, vector<1x32xf32>
    %cst_99 = arith.constant dense<0.000000e+00> : vector<16xf32>
    %299 = vector.multi_reduction <add>, %296, %cst_99 [1] : vector<16x32xf32> to vector<16xf32>
    %300 = vector.shape_cast %299 : vector<16xf32> to vector<16x1xf32>
    %cst_100 = arith.constant 3.200000e+01 : f32
    %301 = vector.broadcast %cst_100 : f32 to vector<16x1xf32>
    %302 = arith.divf %300, %301 : vector<16x1xf32>
    %303 = vector.broadcast %302 : vector<16x1xf32> to vector<16x32xf32>
    %304 = arith.subf %296, %303 : vector<16x32xf32>
    %305 = arith.mulf %304, %304 : vector<16x32xf32>
    %cst_101 = arith.constant dense<0.000000e+00> : vector<16xf32>
    %306 = vector.multi_reduction <add>, %305, %cst_101 [1] : vector<16x32xf32> to vector<16xf32>
    %307 = vector.shape_cast %306 : vector<16xf32> to vector<16x1xf32>
    %cst_102 = arith.constant 3.200000e+01 : f32
    %308 = vector.broadcast %cst_102 : f32 to vector<16x1xf32>
    %309 = arith.divf %307, %308 : vector<16x1xf32>
    %cst_103 = arith.constant 9.99999996E-13 : f32
    %310 = vector.broadcast %cst_103 : f32 to vector<16x1xf32>
    %311 = arith.addf %309, %310 : vector<16x1xf32>
    %312 = math.rsqrt %311 : vector<16x1xf32>
    %313 = vector.broadcast %312 : vector<16x1xf32> to vector<16x32xf32>
    %314 = arith.mulf %304, %313 : vector<16x32xf32>
    %315 = vector.broadcast %297 : vector<1x32xf32> to vector<16x32xf32>
    %316 = arith.mulf %314, %315 : vector<16x32xf32>
    %317 = vector.broadcast %298 : vector<1x32xf32> to vector<16x32xf32>
    %318 = arith.addf %316, %317 : vector<16x32xf32>
    %c3 = arith.constant 3 : index
    %c0_104 = arith.constant 0 : index
    %c0_105 = arith.constant 0 : index
    %319 = vector.load %arg4[%c3, %c0_104, %c0_105] : memref<5x32x128xf32, #tpu.memory_space<vmem>>, vector<1x32x128xf32>
    %320 = vector.shape_cast %319 : vector<1x32x128xf32> to vector<32x128xf32>
    %cst_106 = arith.constant dense<0.000000e+00> : vector<16x128xf32>
    %321 = tpu.matmul %318, %320, %cst_106 {dimension_numbers = #tpu.dot_dimension_numbers<[1], [0], [0], [1], [0, 0, 1, 1], [], []>} : vector<16x32xf32>, vector<32x128xf32>, vector<16x128xf32> -> vector<16x128xf32>
    %c16 = arith.constant 16 : index
    %c0_107 = arith.constant 0 : index
    %322 = vector.load %arg3[%c16, %c0_107] : memref<24x128xf32, #tpu.memory_space<vmem>>, vector<1x128xf32>
    %323 = vector.broadcast %322 : vector<1x128xf32> to vector<16x128xf32>
    %324 = arith.addf %321, %323 : vector<16x128xf32>
    %cst_108 = arith.constant 5.000000e-01 : f32
    %325 = vector.broadcast %cst_108 : f32 to vector<16x128xf32>
    %326 = arith.mulf %325, %324 : vector<16x128xf32>
    %cst_109 = arith.constant 4.471500e-02 : f32
    %327 = vector.broadcast %cst_109 : f32 to vector<16x128xf32>
    %328 = arith.mulf %327, %324 : vector<16x128xf32>
    %329 = arith.mulf %328, %324 : vector<16x128xf32>
    %330 = arith.mulf %329, %324 : vector<16x128xf32>
    %331 = arith.addf %324, %330 : vector<16x128xf32>
    %cst_110 = arith.constant 0.797884583 : f32
    %332 = vector.broadcast %cst_110 : f32 to vector<16x128xf32>
    %333 = arith.mulf %332, %331 : vector<16x128xf32>
    %334 = math.tanh %333 : vector<16x128xf32>
    %cst_111 = arith.constant 1.000000e+00 : f32
    %335 = vector.broadcast %cst_111 : f32 to vector<16x128xf32>
    %336 = arith.addf %335, %334 : vector<16x128xf32>
    %337 = arith.mulf %326, %336 : vector<16x128xf32>
    %c1_112 = arith.constant 1 : index
    %c0_113 = arith.constant 0 : index
    %c0_114 = arith.constant 0 : index
    %338 = vector.load %arg6[%c1_112, %c0_113, %c0_114] : memref<2x128x32xf32, #tpu.memory_space<vmem>>, vector<1x128x32xf32>
    %339 = vector.shape_cast %338 : vector<1x128x32xf32> to vector<128x32xf32>
    %cst_115 = arith.constant dense<0.000000e+00> : vector<16x32xf32>
    %340 = tpu.matmul %337, %339, %cst_115 {dimension_numbers = #tpu.dot_dimension_numbers<[1], [0], [0], [1], [0, 0, 1, 1], [], []>} : vector<16x128xf32>, vector<128x32xf32>, vector<16x32xf32> -> vector<16x32xf32>
    %c17 = arith.constant 17 : index
    %c0_116 = arith.constant 0 : index
    %341 = vector.load %arg3[%c17, %c0_116] : memref<24x128xf32, #tpu.memory_space<vmem>>, vector<1x32xf32>
    %342 = vector.broadcast %341 : vector<1x32xf32> to vector<16x32xf32>
    %343 = arith.addf %340, %342 : vector<16x32xf32>
    %344 = arith.addf %343, %318 : vector<16x32xf32>
    %c18 = arith.constant 18 : index
    %c0_117 = arith.constant 0 : index
    %345 = vector.load %arg3[%c18, %c0_117] : memref<24x128xf32, #tpu.memory_space<vmem>>, vector<1x32xf32>
    %c19 = arith.constant 19 : index
    %c0_118 = arith.constant 0 : index
    %346 = vector.load %arg3[%c19, %c0_118] : memref<24x128xf32, #tpu.memory_space<vmem>>, vector<1x32xf32>
    %cst_119 = arith.constant dense<0.000000e+00> : vector<16xf32>
    %347 = vector.multi_reduction <add>, %344, %cst_119 [1] : vector<16x32xf32> to vector<16xf32>
    %348 = vector.shape_cast %347 : vector<16xf32> to vector<16x1xf32>
    %cst_120 = arith.constant 3.200000e+01 : f32
    %349 = vector.broadcast %cst_120 : f32 to vector<16x1xf32>
    %350 = arith.divf %348, %349 : vector<16x1xf32>
    %351 = vector.broadcast %350 : vector<16x1xf32> to vector<16x32xf32>
    %352 = arith.subf %344, %351 : vector<16x32xf32>
    %353 = arith.mulf %352, %352 : vector<16x32xf32>
    %cst_121 = arith.constant dense<0.000000e+00> : vector<16xf32>
    %354 = vector.multi_reduction <add>, %353, %cst_121 [1] : vector<16x32xf32> to vector<16xf32>
    %355 = vector.shape_cast %354 : vector<16xf32> to vector<16x1xf32>
    %cst_122 = arith.constant 3.200000e+01 : f32
    %356 = vector.broadcast %cst_122 : f32 to vector<16x1xf32>
    %357 = arith.divf %355, %356 : vector<16x1xf32>
    %cst_123 = arith.constant 9.99999996E-13 : f32
    %358 = vector.broadcast %cst_123 : f32 to vector<16x1xf32>
    %359 = arith.addf %357, %358 : vector<16x1xf32>
    %360 = math.rsqrt %359 : vector<16x1xf32>
    %361 = vector.broadcast %360 : vector<16x1xf32> to vector<16x32xf32>
    %362 = arith.mulf %352, %361 : vector<16x32xf32>
    %363 = vector.broadcast %345 : vector<1x32xf32> to vector<16x32xf32>
    %364 = arith.mulf %362, %363 : vector<16x32xf32>
    %365 = vector.broadcast %346 : vector<1x32xf32> to vector<16x32xf32>
    %366 = arith.addf %364, %365 : vector<16x32xf32>
    %367 = vector.shape_cast %366 : vector<16x32xf32> to vector<2x8x32xf32>
    %368 = vector.extract_strided_slice %367 {offsets = [0, 0, 0], sizes = [2, 1, 32], strides = [1, 1, 1]} : vector<2x8x32xf32> to vector<2x1x32xf32>
    %369 = vector.shape_cast %368 : vector<2x1x32xf32> to vector<2x32xf32>
    %c2_124 = arith.constant 2 : index
    %c0_125 = arith.constant 0 : index
    %c0_126 = arith.constant 0 : index
    %370 = vector.load %arg5[%c2_124, %c0_125, %c0_126] : memref<3x32x32xf32, #tpu.memory_space<vmem>>, vector<1x32x32xf32>
    %371 = vector.shape_cast %370 : vector<1x32x32xf32> to vector<32x32xf32>
    %cst_127 = arith.constant dense<0.000000e+00> : vector<2x32xf32>
    %372 = tpu.matmul %369, %371, %cst_127 {dimension_numbers = #tpu.dot_dimension_numbers<[1], [0], [0], [1], [0, 0, 1, 1], [], []>} : vector<2x32xf32>, vector<32x32xf32>, vector<2x32xf32> -> vector<2x32xf32>
    %c2_128 = arith.constant 2 : index
    %c0_129 = arith.constant 0 : index
    %373 = vector.load %arg3[%c2_128, %c0_129] : memref<24x128xf32, #tpu.memory_space<vmem>>, vector<1x32xf32>
    %374 = vector.broadcast %373 : vector<1x32xf32> to vector<2x32xf32>
    %375 = arith.addf %372, %374 : vector<2x32xf32>
    %376 = math.tanh %375 : vector<2x32xf32>
    %c4_130 = arith.constant 4 : index
    %c0_131 = arith.constant 0 : index
    %c0_132 = arith.constant 0 : index
    %377 = vector.load %arg4[%c4_130, %c0_131, %c0_132] : memref<5x32x128xf32, #tpu.memory_space<vmem>>, vector<1x32x128xf32>
    %378 = vector.shape_cast %377 : vector<1x32x128xf32> to vector<32x128xf32>
    %cst_133 = arith.constant dense<0.000000e+00> : vector<2x128xf32>
    %379 = tpu.matmul %376, %378, %cst_133 {dimension_numbers = #tpu.dot_dimension_numbers<[1], [0], [0], [1], [0, 0, 1, 1], [], []>} : vector<2x32xf32>, vector<32x128xf32>, vector<2x128xf32> -> vector<2x128xf32>
    %c3_134 = arith.constant 3 : index
    %c0_135 = arith.constant 0 : index
    %380 = vector.load %arg3[%c3_134, %c0_135] : memref<24x128xf32, #tpu.memory_space<vmem>>, vector<1x128xf32>
    %381 = vector.broadcast %380 : vector<1x128xf32> to vector<2x128xf32>
    %382 = arith.addf %379, %381 : vector<2x128xf32>
    %c0_136 = arith.constant 0 : index
    %c0_137 = arith.constant 0 : index
    %383 = vector.load %arg7[%c0_136, %c0_137] : memref<2x128xf32, #tpu.memory_space<vmem>>, vector<2x128xf32>
    tpu.vector_store %arg7[%c0_136, %c0_137], %382 {strides = array<i32>} : memref<2x128xf32, #tpu.memory_space<vmem>>, vector<2x128xf32>,
    return
  }
}

</mosaic_0001>

<bundles_post_ra>
// kernel: _lambda_.1
= control target key start
LH: loop header
LB: loop body
LE: loop exit
PB: predicated region body
PF: predicated region fallthrough
CT: control target
= control target key end

     0   :  { %vm33_vm0 = vcmask 261120   ;;  %v5096_v37 = vmov 0.0   ;;  %vm5097_vm1 = vmmov 0   ;;  %s5098_s19 = smov 96   ;;  %vm204_vm2 = vcmask 64512   ;;  %s5101_s22 = smov 88   ;;  %s5827_s0 = inlined_call_operand.vmem [shape: f32[16,32], index: 0, kind: input, shape index: {}]   ;;  %s5828_s1 = inlined_call_operand.vmem [shape: f32[8,32], index: 1, kind: input, shape index: {}]   ;;  %s5829_s4 = inlined_call_operand.vmem [shape: f32[5,32,128], index: 4, kind: input, shape index: {}]   ;;  %s5830_s3 = inlined_call_operand.vmem [shape: f32[24,128], index: 3, kind: input, shape index: {}]   ;;  %s5831_s2 = inlined_call_operand.vmem [shape: f32[2,8], index: 2, kind: input, shape index: {}]   ;;  %s5832_s5 = inlined_call_operand.vmem [shape: f32[3,32,32], index: 5, kind: input, shape index: {}]   ;;  %s5833_s6 = inlined_call_operand.vmem [shape: f32[2,128,32], index: 6, kind: input, shape index: {}]   ;;  %s5834_s7 = inlined_call_operand.vmem [shape: f32[2,128], index: 7, kind: output, shape index: {}]  }
   0x1   :  { %v26_v0 = vld [vmem:[%s5827_s0] sm:$0xff]  ;;  %v27_v2 = vld [vmem:[%s5827_s0 + $0x8] sm:$0xff]  ;;  %v110_v17 = vld [vmem:[%s5829_s4 + $0x18] sm:$0xff]  ;;  %4668 = vmatprep.subr.mxu1 %v5096_v37  ;;  %4670 = vmatprep.mubr.msk.f32.mxu1 %vm5097_vm1, %v5096_v37  ;;  %v5099_v45 = vmov 1966171168   ;;  %v86_v47 = vlaneseq  ;;  %s5102_s23 = smov 120  }
   0x2   :  { %v28_v1 = vld [vmem:[%s5828_s1] sm:$0xff]  ;;  %v109_v18 = vld [vmem:[%s5829_s4 + $0x10] sm:$0xff]  ;;  %4652 = vmatprep.subr.mxu0 %v110_v17  ;;  %v108_v19 = vld [vmem:[%s5829_s4 + $0x8] sm:$0xff]  ;;  %v84_v46 = vunpack.c.l.s4 %v5099_v45  ;;  %s5103_s24 = smov 56   ;;  %s5104_s25 = smov 80   ;;  %vm4196_vm3 = vcmask 1041409  }
   0x3   :  { %v29_v3 = vadd.f32 %v28_v1, %v26_v0  ;;  %v30_v4 = vadd.f32 %v28_v1, %v27_v2  ;;  %4653 = vmatpush3.msra.mxu0 %v110_v17  ;;  %v107_v20 = vld [vmem:[%s5829_s4] sm:$0xff]  ;;  %v87_v49 = vshrl.u32 %v86_v47, 7  ;;  %s5105_s26 = smov 112   ;;  %s5106_s1 = smov 48  }
   0x4   :  { %4654 = vmatprep.subr.mxu0 %v109_v18  ;;  %v4359_v28 = vld [vmem:[%s5830_s3] ss:$0 sm:$0xff]  ;;  %v4360_v30 = vld [vmem:[%s5830_s3 + $0x1] ss:$0 sm:$0xff]  ;;  %v4362_v38 = vld [vmem:[%s5830_s3 + $0x4] ss:$0 sm:$0xff]  ;;  %v85_v48 = vunpack.c.0.s8 %v84_v46 }
   0x5   :  { %v34_v5 = vsel %vm33_vm0, %v29_v3, 0.0  ;;  %v37_v6 = vsel %vm33_vm0, %v30_v4, 0.0  ;;  %4655 = vmatpush3.msra.mxu0 %v109_v18  ;;  %v4361_v50 = vld.sshfl [vmem:[%s5831_s2] sm:$0x11 pattern:$0x75316420] }
   0x6   :  { %35 = vadd.xlane.f32.xlu0 %v34_v5  ;;  %4656 = vmatprep.subr.mxu0 %v108_v19  ;;  %v82_v51 = vcombine.high %v4361_v50, %v4361_v50  ;;  %v88_v52 = vsub.s32 %v85_v48, %v87_v49  ;;  %v99_v54 = vsub.s32 0, %v87_v49  ;;  %s5100_s2 = smov 64   ;;  %s5107_s30 = smov 72  }
   0x7   :  { %4657 = vmatpush3.msra.mxu0 %v108_v19  ;;  %s5108_s8 = smov 104   ;;  %s5109_s11 = smov 40  }
   0x8   :  { %4658 = vmatprep.subr.mxu0 %v107_v20  ;;  %v96_v53 = vrot.slane %v82_v51, %v88_v52  ;;  %v89_v55 = vrot.slane %v4361_v50, %v88_v52  ;;  %v197_v52 = vld [vmem:[%s5832_s5] sm:$0xff] }
   0x9   :  { %4659 = vmatpush3.msra.mxu0 %v107_v20 }
   0xa   :  { %38 = vadd.xlane.f32.xlu0 %v37_v6  ;;  %4663 = vmatprep.subr.mxu0 %v5096_v37  ;;  %v5221_v56 = vrot.slane %v96_v53, %v99_v54  ;;  %v5223_v57 = vrot.slane %v89_v55, %v99_v54 }
  0x8f   :  { %v36_v7 = vpop.xlane.xlu0 %35 }
  0x90   :  { %v41_v8 = vmul.f32 0.03125, %v36_v7 }
  0x92   :  { %v43_v9 = vsub.f32 %v29_v3, %v41_v8 }
  0x93   :  { %v39_v10 = vpop.xlane.xlu0 %38 }
  0x94   :  { %v42_v11 = vmul.f32 0.03125, %v39_v10  ;;  %v45_v12 = vmul.f32 %v43_v9, %v43_v9 }
  0x96   :  { %v44_v13 = vsub.f32 %v30_v4, %v42_v11  ;;  %v47_v14 = vsel %vm33_vm0, %v45_v12, 0.0 }
  0x97   :  { %48 = vadd.xlane.f32.xlu1 %v47_v14 }
  0x98   :  { %v46_v15 = vmul.f32 %v44_v13, %v44_v13 }
  0x9a   :  { %v50_v16 = vsel %vm33_vm0, %v46_v15, 0.0 }
  0x9b   :  { %51 = vadd.xlane.f32.xlu1 %v50_v16 }
 0x120   :  { %v49_v21 = vpop.xlane.xlu1 %48 }
 0x121   :  { %v53_v22 = vmul.f32 0.03125, %v49_v21 }
 0x123   :  { %v55_v23 = vadd.f32 1e-12, %v53_v22 }
 0x124   :  { %v52_v24 = vpop.xlane.xlu1 %51 }
 0x125   :  { %5002 = vrsqrt.f32 %v55_v23  ;;  %v54_v25 = vmul.f32 0.03125, %v52_v24 }
 0x127   :  { %v56_v26 = vadd.f32 1e-12, %v54_v25 }
 0x129   :  { %5004 = vrsqrt.f32 %v56_v26 }
 0x132   :  { %v5003_v27 = vpop.eup %5002 }
 0x133   :  { %v59_v29 = vmul.f32 %v5003_v27, %v43_v9 }
 0x135   :  { %v65_v31 = vmul.f32 %v4359_v28, %v59_v29 }
 0x136   :  { %v5005_v32 = vpop.eup %5004 }
 0x137   :  { %v60_v33 = vmul.f32 %v5005_v32, %v44_v13  ;;  %v5181_v34 = vadd.f32 %v4360_v30, %v65_v31 }
 0x139   :  { %v66_v35 = vmul.f32 %v4359_v28, %v60_v33  ;;  %4660 = vmatprep.mubr.msk.f32.mxu0 %vm33_vm0, %v5181_v34 }
 0x13b   :  { %v5185_v36 = vadd.f32 %v4360_v30, %v66_v35 }
 0x13d   :  { %4661 = vmatmul.mubr.msk.f32.vlgmr.msra.gmra.mxu0 %vm33_vm0, %v5185_v36 }
 0x13e   :  { %4665 = vmatprep.mubr.msk.f32.mxu0 %vm5097_vm1, %v5096_v37 }
 0x1fd   :  { %v4662_v39 = vpop.f32.mrf.mxu0 }
 0x1fe   :  { %v5198_v40 = vadd.f32 %v4662_v39, %v4362_v38 }
 0x1ff   :  { %v188_v41 = vpop.f32.mrf.mxu0 }
 0x200   :  { %v5200_v42 = vadd.f32 %v4362_v38, %v188_v41  ;;  %280 = vrot.lane.b32.xlu1 %v5198_v40, %s5098_s19 }
 0x202   :  { %202 = vrot.lane.b32.xlu0 %v5200_v42, %s5098_s19 }
 0x272   :  { %v281_v43 = vpop.permute.xlu1 %280 }
 0x273   :  { %4669 = vmatpush3.xpose.msk.msra.mxu1 %vm204_vm2, %v281_v43 }
 0x274   :  { %v203_v44 = vpop.permute.xlu0 %202  ;;  %4678 = vmatprep.subr.mxu1 %v5096_v37 }
 0x275   :  { %4664 = vmatpush3.xpose.msk.msra.mxu0 %vm204_vm2, %v203_v44 }
 0x276   :  { %4671 = vmatmul.mubr.msk.f32.vlgmr.msra.gmra.mxu1 %vm204_vm2, %v5198_v40  ;;  %4673 = vmatprep.subr.mxu0 %v5096_v37 }
 0x277   :  { %4680 = vmatprep.mubr.msk.f32.mxu1 %vm5097_vm1, %v5096_v37 }
 0x278   :  { %4666 = vmatmul.mubr.msk.f32.vlgmr.msra.gmra.mxu0 %vm204_vm2, %v5200_v42 }
 0x279   :  { %4675 = vmatprep.mubr.msk.f32.mxu0 %vm5097_vm1, %v5096_v37 }
 0x336   :  { %v352_v58 = vpop.f32.mrf.mxu1 }
 0x337   :  { %v353_v59 = vadd.f32 %v352_v58, %v5221_v56 }
 0x338   :  { %v275_v60 = vpop.f32.mrf.mxu0  ;;  %v4672_v61 = vpop.f32.mrf.mxu1 }
 0x339   :  { %v276_v62 = vadd.f32 %v275_v60, %v5223_v57  ;;  %v359_v63 = vsel %vm204_vm2, %v353_v59, -inf }
 0x33a   :  { %360 = vmax.xlane.f32.xlu0 %v359_v63  ;;  %v4667_v0 = vpop.f32.mrf.mxu0 }
 0x33b   :  { %v356_v1 = vsel %vm204_vm2, %v276_v62, -inf }
 0x33c   :  { %357 = vmax.xlane.f32.xlu1 %v356_v1  ;;  %v198_v1 = vld [vmem:[%s5832_s5 + $0x8] sm:$0xff] }
 0x3c3   :  { %v361_v2 = vpop.xlane.xlu0 %360 }
 0x3c4   :  { %v363_v3 = vsub.f32 %v353_v59, %v361_v2 }
 0x3c5   :  { %v358_v4 = vpop.xlane.xlu1 %357 }
 0x3c6   :  { %v366_v5 = vmul.f32 1.442695, %v363_v3  ;;  %v362_v6 = vsub.f32 %v276_v62, %v358_v4 }
 0x3c8   :  { %5006 = vpow2.f32 %v366_v5  ;;  %v364_v7 = vmul.f32 1.442695, %v362_v6 }
 0x3ca   :  { %5008 = vpow2.f32 %v364_v7 }
 0x3d5   :  { %v5007_v8 = vpop.eup %5006 }
 0x3d6   :  { %v371_v9 = vsel %vm204_vm2, %v5007_v8, 0.0 }
 0x3d7   :  { %v5009_v10 = vpop.eup %5008  ;;  %372 = vadd.xlane.f32.xlu1 %v371_v9 }
 0x3d8   :  { %v368_v11 = vsel %vm204_vm2, %v5009_v10, 0.0 }
 0x3d9   :  { %369 = vadd.xlane.f32.xlu0 %v368_v11 }
 0x3e8   :  { %454 = vrot.lane.b32.xlu1 %v5198_v40, %s5100_s2 }
 0x3ec   :  { %532 = vrot.lane.b32.xlu1 %v5200_v42, %s5101_s22 }
 0x3ef   :  { %378 = vrot.lane.b32.xlu0 %v5200_v42, %s5100_s2 }
 0x3f0   :  { %610 = vrot.lane.b32.xlu1 %v5198_v40, %s5101_s22 }
 0x3f3   :  { %530 = vrot.lane.b32.xlu0 %v5200_v42, %s5102_s23 }
 0x3f4   :  { %608 = vrot.lane.b32.xlu1 %v5198_v40, %s5102_s23 }
 0x460   :  { %v373_v12 = vpop.xlane.xlu1 %372 }
 0x461   :  { %5010 = vrcp.f32 %v373_v12 }
 0x462   :  { %v370_v13 = vpop.xlane.xlu0 %369 }
 0x463   :  { %5012 = vrcp.f32 %v370_v13 }
 0x464   :  { %v455_v14 = vpop.permute.xlu1 %454 }
 0x465   :  { %4679 = vmatpush3.msra.mxu1 %v455_v14 }
 0x466   :  { %v379_v15 = vpop.permute.xlu0 %378  ;;  %4688 = vmatprep.subr.mxu1 %v5096_v37 }
 0x467   :  { %4674 = vmatpush3.msra.mxu0 %v379_v15 }
 0x468   :  { %v533_v16 = vpop.permute.xlu1 %532  ;;  %4683 = vmatprep.subr.mxu0 %v5096_v37 }
 0x46a   :  { %v531_v23 = vpop.permute.xlu0 %530 }
 0x46c   :  { %v611_v18 = vpop.permute.xlu1 %610 }
 0x46e   :  { %v5011_v17 = vpop.eup %5010 }
 0x46f   :  { %v377_v19 = vmul.f32 %v5011_v17, %v5007_v8 }
 0x470   :  { %v5013_v20 = vpop.eup %5012  ;;  %v609_v22 = vpop.permute.xlu1 %608 }
 0x471   :  { %4681 = vmatmul.mubr.msk.f32.vlgmr.msra.gmra.mxu1 %vm204_vm2, %v377_v19  ;;  %v376_v21 = vmul.f32 %v5013_v20, %v5009_v10 }
 0x472   :  { %4689 = vmatpush3.xpose.msk.msra.mxu1 %vm204_vm2, %v611_v18  ;;  %4690 = vmatprep.mubr.msk.f32.mxu1 %vm5097_vm1, %v5096_v37 }
 0x473   :  { %4676 = vmatmul.mubr.msk.f32.vlgmr.msra.gmra.mxu0 %vm204_vm2, %v376_v21  ;;  %4698 = vmatprep.subr.mxu1 %v5096_v37 }
 0x474   :  { %4684 = vmatpush3.xpose.msk.msra.mxu0 %vm204_vm2, %v533_v16  ;;  %4685 = vmatprep.mubr.msk.f32.mxu0 %vm5097_vm1, %v5096_v37 }
 0x475   :  { %4691 = vmatmul.mubr.msk.f32.vlgmr.msra.gmra.mxu1 %vm204_vm2, %v609_v22  ;;  %4693 = vmatprep.subr.mxu0 %v5096_v37 }
 0x476   :  { %4700 = vmatprep.mubr.msk.f32.mxu1 %vm5097_vm1, %v5096_v37 }
 0x477   :  { %4686 = vmatmul.mubr.msk.f32.vlgmr.msra.gmra.mxu0 %vm204_vm2, %v531_v23 }
 0x478   :  { %4695 = vmatprep.mubr.msk.f32.mxu0 %vm5097_vm1, %v5096_v37 }
 0x531   :  { %v526_v24 = vpop.f32.mrf.mxu1 }
 0x533   :  { %v450_v25 = vpop.f32.mrf.mxu0  ;;  %v4682_v26 = vpop.f32.mrf.mxu1 }
 0x535   :  { %v4677_v27 = vpop.f32.mrf.mxu0  ;;  %v682_v28 = vpop.f32.mrf.mxu1 }
 0x536   :  { %v683_v29 = vadd.f32 %v682_v28, %v5221_v56 }
 0x537   :  { %v604_v30 = vpop.f32.mrf.mxu0  ;;  %v4692_v31 = vpop.f32.mrf.mxu1 }
 0x538   :  { %v605_v32 = vadd.f32 %v604_v30, %v5223_v57  ;;  %v689_v33 = vsel %vm204_vm2, %v683_v29, -inf }
 0x539   :  { %690 = vmax.xlane.f32.xlu1 %v689_v33  ;;  %v4687_v35 = vpop.f32.mrf.mxu0 }
 0x53a   :  { %v686_v38 = vsel %vm204_vm2, %v605_v32, -inf }
 0x53b   :  { %687 = vmax.xlane.f32.xlu0 %v686_v38 }
 0x54a   :  { %784 = vrot.lane.b32.xlu1 %v5198_v40, %s5103_s24 }
 0x54e   :  { %1024 = vrot.lane.b32.xlu1 %v5200_v42, %s5104_s25 }
 0x552   :  { %1102 = vrot.lane.b32.xlu1 %v5198_v40, %s5104_s25 }
 0x556   :  { %1100 = vrot.lane.b32.xlu1 %v5198_v40, %s5105_s26 }
 0x5c2   :  { %v691_v39 = vpop.xlane.xlu1 %690 }
 0x5c3   :  { %v693_v41 = vsub.f32 %v683_v29, %v691_v39 }
 0x5c4   :  { %v688_v43 = vpop.xlane.xlu0 %687 }
 0x5c5   :  { %v696_v44 = vmul.f32 1.442695, %v693_v41  ;;  %v692_v45 = vsub.f32 %v605_v32, %v688_v43 }
 0x5c6   :  { %v785_v46 = vpop.permute.xlu1 %784 }
 0x5c7   :  { %5014 = vpow2.f32 %v696_v44  ;;  %v694_v47 = vmul.f32 1.442695, %v692_v45  ;;  %4699 = vmatpush3.msra.mxu1 %v785_v46  ;;  %v199_v46 = vld [vmem:[%s5832_s5 + $0x10] sm:$0xff] }
 0x5c8   :  { %4708 = vmatprep.subr.mxu1 %v197_v52 }
 0x5c9   :  { %5016 = vpow2.f32 %v694_v47 }
 0x5ca   :  { %v1025_v58 = vpop.permute.xlu1 %1024 }
 0x5ce   :  { %v1103_v62 = vpop.permute.xlu1 %1102 }
 0x5d2   :  { %v1101_v0 = vpop.permute.xlu1 %1100 }
 0x5d4   :  { %v5015_v48 = vpop.eup %5014 }
 0x5d5   :  { %v701_v49 = vsel %vm204_vm2, %v5015_v48, 0.0 }
 0x5d6   :  { %v5017_v50 = vpop.eup %5016  ;;  %702 = vadd.xlane.f32.xlu0 %v701_v49 }
 0x5d7   :  { %v698_v51 = vsel %vm204_vm2, %v5017_v50, 0.0 }
 0x5da   :  { %699 = vadd.xlane.f32.xlu0 %v698_v51 }
 0x5f0   :  { %708 = vrot.lane.b32.xlu0 %v5200_v42, %s5103_s24 }
 0x5f4   :  { %1022 = vrot.lane.b32.xlu0 %v5200_v42, %s5105_s26 }
 0x65f   :  { %v703_v53 = vpop.xlane.xlu0 %702 }
 0x660   :  { %5018 = vrcp.f32 %v703_v53 }
 0x663   :  { %v700_v54 = vpop.xlane.xlu0 %699 }
 0x664   :  { %5020 = vrcp.f32 %v700_v54 }
 0x667   :  { %v709_v55 = vpop.permute.xlu0 %708 }
 0x668   :  { %4694 = vmatpush3.msra.mxu0 %v709_v55 }
 0x669   :  { %4703 = vmatprep.subr.mxu0 %v198_v1 }
 0x66b   :  { %v1023_v9 = vpop.permute.xlu0 %1022 }
 0x66d   :  { %v5019_v59 = vpop.eup %5018 }
 0x66e   :  { %v707_v60 = vmul.f32 %v5019_v59, %v5015_v48 }
 0x670   :  { %4701 = vmatmul.mubr.msk.f32.vlgmr.msra.gmra.mxu1 %vm204_vm2, %v707_v60 }
 0x671   :  { %v5021_v61 = vpop.eup %5020  ;;  %4710 = vmatprep.mubr.msk.f32.mxu1 %vm204_vm2, %v450_v25  ;;  %4709 = vmatpush3.msra.mxu1 %v197_v52 }
 0x672   :  { %4718 = vmatprep.subr.mxu1 %v5096_v37  ;;  %v706_v63 = vmul.f32 %v5021_v61, %v5017_v50 }
 0x674   :  { %4696 = vmatmul.mubr.msk.f32.vlgmr.msra.gmra.mxu0 %vm204_vm2, %v706_v63  ;;  %4711 = vmatmul.mubr.msk.f32.vlgmr.msra.gmra.mxu1 %vm204_vm2, %v526_v24 }
 0x675   :  { %4719 = vmatpush3.xpose.msk.msra.mxu1 %vm204_vm2, %v1103_v62  ;;  %4720 = vmatprep.mubr.msk.f32.mxu1 %vm5097_vm1, %v5096_v37 }
 0x676   :  { %4728 = vmatprep.subr.mxu1 %v5096_v37  ;;  %4704 = vmatpush3.msra.mxu0 %v198_v1 }
 0x677   :  { %4713 = vmatprep.subr.mxu0 %v5096_v37 }
 0x678   :  { %4721 = vmatmul.mubr.msk.f32.vlgmr.msra.gmra.mxu1 %vm204_vm2, %v1101_v0 }
 0x679   :  { %4730 = vmatprep.mubr.msk.f32.mxu1 %vm5097_vm1, %v5096_v37 }
 0x730   :  { %v856_v2 = vpop.f32.mrf.mxu1 }
 0x732   :  { %v4702_v3 = vpop.f32.mrf.mxu1 }
 0x734   :  { %v780_v4 = vpop.f32.mrf.mxu0  ;;  %v5298_v5 = vpop.f32.mrf.mxu1 }
 0x735   :  { %4705 = vmatprep.mubr.msk.f32.mxu0 %vm204_vm2, %v780_v4 }
 0x736   :  { %v4697_v6 = vpop.f32.mrf.mxu0  ;;  %4706 = vmatmul.mubr.msk.f32.vlgmr.msra.gmra.mxu0 %vm204_vm2, %v856_v2  ;;  %v5302_v7 = vpop.f32.mrf.mxu1 }
 0x737   :  { %4714 = vmatpush3.xpose.msk.msra.mxu0 %vm204_vm2, %v1025_v58  ;;  %4715 = vmatprep.mubr.msk.f32.mxu0 %vm5097_vm1, %v5096_v37 }
 0x738   :  { %v1174_v8 = vpop.f32.mrf.mxu1  ;;  %4723 = vmatprep.subr.mxu0 %v5096_v37 }
 0x739   :  { %v1175_v10 = vadd.f32 %v1174_v8, %v5221_v56 }
 0x73a   :  { %4716 = vmatmul.mubr.msk.f32.vlgmr.msra.gmra.mxu0 %vm204_vm2, %v1023_v9  ;;  %v4722_v11 = vpop.f32.mrf.mxu1 }
 0x73b   :  { %v1181_v12 = vsel %vm204_vm2, %v1175_v10, -inf  ;;  %4725 = vmatprep.mubr.msk.f32.mxu0 %vm5097_vm1, %v5096_v37 }
 0x73c   :  { %1182 = vmax.xlane.f32.xlu1 %v1181_v12 }
 0x74d   :  { %1276 = vrot.lane.b32.xlu1 %v5198_v40, %s5106_s1 }
 0x751   :  { %1437 = vrot.lane.b32.xlu1 %v5200_v42, %s5107_s30 }
 0x755   :  { %1515 = vrot.lane.b32.xlu1 %v5198_v40, %s5107_s30 }
 0x759   :  { %1513 = vrot.lane.b32.xlu1 %v5198_v40, %s5108_s8 }
 0x7c5   :  { %v1183_v13 = vpop.xlane.xlu1 %1182 }
 0x7c6   :  { %v1185_v15 = vsub.f32 %v1175_v10, %v1183_v13 }
 0x7c8   :  { %v1188_v16 = vmul.f32 1.442695, %v1185_v15 }
 0x7c9   :  { %v1277_v14 = vpop.permute.xlu1 %1276 }
 0x7ca   :  { %4729 = vmatpush3.msra.mxu1 %v1277_v14  ;;  %5022 = vpow2.f32 %v1188_v16 }
 0x7cb   :  { %4738 = vmatprep.subr.mxu1 %v5096_v37 }
 0x7cd   :  { %v1438_v33 = vpop.permute.xlu1 %1437 }
 0x7d1   :  { %v1516_v51 = vpop.permute.xlu1 %1515 }
 0x7d5   :  { %v1514_v54 = vpop.permute.xlu1 %1513 }
 0x7d7   :  { %v5023_v23 = vpop.eup %5022 }
 0x7d8   :  { %v1193_v24 = vsel %vm204_vm2, %v5023_v23, 0.0 }
 0x7f6   :  { %v5322_v17 = vpop.f32.mrf.mxu0 }
 0x7f7   :  { %v1019_v62 = vadd.f32 %v5298_v5, %v5322_v17 }
 0x7f8   :  { %v5324_v18 = vpop.f32.mrf.mxu0 }
 0x7f9   :  { %v1014_v0 = vadd.f32 %v5302_v7, %v5324_v18 }
 0x7fa   :  { %v1096_v19 = vpop.f32.mrf.mxu0 }
 0x7fb   :  { %v1097_v20 = vadd.f32 %v1096_v19, %v5223_v57 }
 0x7fc   :  { %v4717_v21 = vpop.f32.mrf.mxu0 }
 0x7fd   :  { %v1178_v22 = vsel %vm204_vm2, %v1097_v20, -inf }
 0x7fe   :  { %1179 = vmax.xlane.f32.xlu0 %v1178_v22 }
 0x802   :  { %1194 = vadd.xlane.f32.xlu0 %v1193_v24 }
 0x887   :  { %v1180_v25 = vpop.xlane.xlu0 %1179 }
 0x888   :  { %v1184_v26 = vsub.f32 %v1097_v20, %v1180_v25  ;;  %v200_v20 = vld [vmem:[%s5832_s5 + $0x18] sm:$0xff]  ;;  %v4397_v25 = vld [vmem:[%s5830_s3 + $0x5] ss:$0 sm:$0xff] }
 0x88a   :  { %v1186_v27 = vmul.f32 1.442695, %v1184_v26 }
 0x88b   :  { %v1195_v28 = vpop.xlane.xlu0 %1194 }
 0x88c   :  { %5024 = vpow2.f32 %v1186_v27 }
 0x88d   :  { %5026 = vrcp.f32 %v1195_v28 }
 0x899   :  { %v5025_v29 = vpop.eup %5024 }
 0x89a   :  { %v5027_v30 = vpop.eup %5026  ;;  %v1190_v31 = vsel %vm204_vm2, %v5025_v29, 0.0 }
 0x89b   :  { %1191 = vadd.xlane.f32.xlu0 %v1190_v31  ;;  %v1199_v32 = vmul.f32 %v5027_v30, %v5023_v23 }
 0x89d   :  { %4731 = vmatmul.mubr.msk.f32.vlgmr.msra.gmra.mxu1 %vm204_vm2, %v1199_v32 }
 0x89e   :  { %4739 = vmatpush3.xpose.msk.msra.mxu1 %vm204_vm2, %v1438_v33  ;;  %4740 = vmatprep.mubr.msk.f32.mxu1 %vm5097_vm1, %v5096_v37 }
 0x89f   :  { %4748 = vmatprep.subr.mxu1 %v5096_v37 }
 0x8b1   :  { %1200 = vrot.lane.b32.xlu0 %v5200_v42, %s5106_s1 }
 0x8b5   :  { %1435 = vrot.lane.b32.xlu0 %v5200_v42, %s5108_s8 }
 0x924   :  { %v1192_v35 = vpop.xlane.xlu0 %1191 }
 0x925   :  { %5028 = vrcp.f32 %v1192_v35 }
 0x928   :  { %v1201_v38 = vpop.permute.xlu0 %1200 }
 0x929   :  { %4724 = vmatpush3.msra.mxu0 %v1201_v38 }
 0x92a   :  { %4733 = vmatprep.subr.mxu0 %v199_v46 }
 0x92c   :  { %v1436_v39 = vpop.permute.xlu0 %1435 }
 0x92d   :  { %4741 = vmatmul.mubr.msk.f32.vlgmr.msra.gmra.mxu1 %vm204_vm2, %v1436_v39 }
 0x92e   :  { %4750 = vmatprep.mubr.msk.f32.mxu1 %vm5097_vm1, %v5096_v37 }
 0x932   :  { %v5029_v41 = vpop.eup %5028 }
 0x933   :  { %v1198_v43 = vmul.f32 %v5029_v41, %v5025_v29 }
 0x935   :  { %4726 = vmatmul.mubr.msk.f32.vlgmr.msra.gmra.mxu0 %vm204_vm2, %v1198_v43 }
 0x936   :  { %4734 = vmatpush3.msra.mxu0 %v199_v46 }
 0x937   :  { %4743 = vmatprep.subr.mxu0 %v5096_v37 }
 0x95d   :  { %v1348_v44 = vpop.f32.mrf.mxu1 }
 0x95f   :  { %v4732_v45 = vpop.f32.mrf.mxu1 }
 0x9ed   :  { %v1509_v47 = vpop.f32.mrf.mxu1 }
 0x9ee   :  { %v1510_v48 = vadd.f32 %v1509_v47, %v5223_v57 }
 0x9ef   :  { %v4742_v49 = vpop.f32.mrf.mxu1 }
 0x9f0   :  { %v1591_v50 = vsel %vm204_vm2, %v1510_v48, -inf  ;;  %v4402_v49 = vld [vmem:[%s5829_s4 + $0x50] sm:$0xff] }
 0x9f1   :  { %1592 = vmax.xlane.f32.xlu0 %v1591_v50  ;;  %v4401_v50 = vld [vmem:[%s5829_s4 + $0x48] sm:$0xff] }
 0x9f5   :  { %v1272_v52 = vpop.f32.mrf.mxu0 }
 0x9f6   :  { %4735 = vmatprep.mubr.msk.f32.mxu0 %vm204_vm2, %v1272_v52 }
 0x9f7   :  { %v4727_v53 = vpop.f32.mrf.mxu0  ;;  %4736 = vmatmul.mubr.msk.f32.vlgmr.msra.gmra.mxu0 %vm204_vm2, %v1348_v44 }
 0x9f8   :  { %4744 = vmatpush3.xpose.msk.msra.mxu0 %vm204_vm2, %v1516_v51  ;;  %4745 = vmatprep.mubr.msk.f32.mxu0 %vm5097_vm1, %v5096_v37  ;;  %v4400_v51 = vld [vmem:[%s5829_s4 + $0x40] sm:$0xff] }
 0x9f9   :  { %4753 = vmatprep.subr.mxu0 %v5096_v37 }
 0x9fb   :  { %4746 = vmatmul.mubr.msk.f32.vlgmr.msra.gmra.mxu0 %vm204_vm2, %v1514_v54 }
 0x9fc   :  { %4755 = vmatprep.mubr.msk.f32.mxu0 %vm5097_vm1, %v5096_v37 }
 0xa7a   :  { %v1593_v55 = vpop.xlane.xlu0 %1592 }
 0xa7b   :  { %v1597_v58 = vsub.f32 %v1510_v48, %v1593_v55 }
 0xa7d   :  { %v1599_v59 = vmul.f32 1.442695, %v1597_v58 }
 0xa7f   :  { %5030 = vpow2.f32 %v1599_v59 }
 0xa8c   :  { %v5031_v60 = vpop.eup %5030 }
 0xa8d   :  { %v1603_v61 = vsel %vm204_vm2, %v5031_v60, 0.0 }
 0xa8e   :  { %1604 = vadd.xlane.f32.xlu0 %v1603_v61  ;;  %v4398_v61 = vld [vmem:[%s5830_s3 + $0x6] ss:$0 sm:$0xff] }
 0xab7   :  { %v4737_v63 = vpop.f32.mrf.mxu0 }
 0xab8   :  { %v1434_v1 = vadd.f32 %v4737_v63, %v1019_v62 }
 0xab9   :  { %v1424_v2 = vpop.f32.mrf.mxu0 }
 0xaba   :  { %v1433_v3 = vadd.f32 %v1424_v2, %v1014_v0  ;;  %v4399_v2 = vld [vmem:[%s5830_s3 + $0x7] ss:$0 sm:$0xff] }
 0xabb   :  { %v1587_v4 = vpop.f32.mrf.mxu0 }
 0xabc   :  { %v1588_v6 = vadd.f32 %v1587_v4, %v5221_v56 }
 0xabd   :  { %v4747_v8 = vpop.f32.mrf.mxu0 }
 0xabe   :  { %v1594_v9 = vsel %vm204_vm2, %v1588_v6, -inf  ;;  %v2021_v8 = vld [vmem:[%s5833_s6 + $0x78] sm:$0xff] }
 0xabf   :  { %1595 = vmax.xlane.f32.xlu1 %v1594_v9  ;;  %v2020_v9 = vld [vmem:[%s5833_s6 + $0x70] sm:$0xff] }
 0xad0   :  { %1689 = vrot.lane.b32.xlu1 %v5198_v40, %s5109_s11 }
 0xb17   :  { %v1605_v14 = vpop.xlane.xlu0 %1604 }
 0xb48   :  { %v1596_v10 = vpop.xlane.xlu1 %1595 }
 0xb49   :  { %v1598_v5 = vsub.f32 %v1588_v6, %v1596_v10  ;;  %v2019_v10 = vld [vmem:[%s5833_s6 + $0x68] sm:$0xff] }
 0xb4b   :  { %v1601_v11 = vmul.f32 1.442695, %v1598_v5  ;;  %v2018_v5 = vld [vmem:[%s5833_s6 + $0x60] sm:$0xff] }
 0xb4c   :  { %v1690_v12 = vpop.permute.xlu1 %1689 }
 0xb4d   :  { %5032 = vpow2.f32 %v1601_v11  ;;  %4754 = vmatpush3.msra.mxu0 %v1690_v12  ;;  %v2017_v11 = vld [vmem:[%s5833_s6 + $0x58] sm:$0xff]  ;;  %v2016_v12 = vld [vmem:[%s5833_s6 + $0x50] sm:$0xff] }
 0xb4e   :  { %5034 = vrcp.f32 %v1605_v14  ;;  %v2013_v14 = vld [vmem:[%s5833_s6 + $0x38] sm:$0xff] }
 0xb5a   :  { %v5033_v7 = vpop.eup %5032 }
 0xb5b   :  { %v1606_v13 = vsel %vm204_vm2, %v5033_v7, 0.0  ;;  %v5035_v16 = vpop.eup %5034 }
 0xb5c   :  { %1607 = vadd.xlane.f32.xlu0 %v1606_v13  ;;  %v1611_v40 = vmul.f32 %v5035_v16, %v5031_v60  ;;  %v2014_v13 = vld [vmem:[%s5833_s6 + $0x40] sm:$0xff]  ;;  %v2011_v16 = vld [vmem:[%s5833_s6 + $0x28] sm:$0xff] }
 0xb72   :  { %1613 = vrot.lane.b32.xlu0 %v5200_v42, %s5109_s11 }
 0xbe5   :  { %v1608_v15 = vpop.xlane.xlu0 %1607 }
 0xbe6   :  { %5036 = vrcp.f32 %v1608_v15  ;;  %v2012_v15 = vld [vmem:[%s5833_s6 + $0x30] sm:$0xff] }
 0xbe9   :  { %v1614_v17 = vpop.permute.xlu0 %1613 }
 0xbea   :  { %4749 = vmatpush3.msra.mxu1 %v1614_v17  ;;  %v2010_v17 = vld [vmem:[%s5833_s6 + $0x20] sm:$0xff] }
 0xbeb   :  { %4751 = vmatmul.mubr.msk.f32.vlgmr.msra.gmra.mxu1 %vm204_vm2, %v1611_v40  ;;  %4758 = vmatprep.subr.mxu1 %v200_v20  ;;  %v2009_v40 = vld [vmem:[%s5833_s6 + $0x18] sm:$0xff] }
 0xbec   :  { %4759 = vmatpush3.msra.mxu1 %v200_v20  ;;  %v2006_v20 = vld [vmem:[%s5833_s6] sm:$0xff] }
 0xbed   :  { %4774 = vmatprep.subr.mxu1 %v2021_v8 }
 0xbf3   :  { %v5037_v18 = vpop.eup %5036 }
 0xbf4   :  { %v1612_v19 = vmul.f32 %v5037_v18, %v5033_v7  ;;  %v2015_v7 = vld [vmem:[%s5833_s6 + $0x48] sm:$0xff]  ;;  %v2008_v18 = vld [vmem:[%s5833_s6 + $0x10] sm:$0xff] }
 0xbf6   :  { %4756 = vmatmul.mubr.msk.f32.vlgmr.msra.gmra.mxu0 %vm204_vm2, %v1612_v19  ;;  %v2007_v19 = vld [vmem:[%s5833_s6 + $0x8] sm:$0xff] }
 0xcab   :  { %v1685_v42 = vpop.f32.mrf.mxu1 }
 0xcac   :  { %4760 = vmatprep.mubr.msk.f32.mxu1 %vm204_vm2, %v1685_v42  ;;  %v4404_v42 = vld [vmem:[%s5830_s3 + $0x8] ss:$0 sm:$0xff] }
 0xcad   :  { %v4752_v21 = vpop.f32.mrf.mxu1 }
 0xcb6   :  { %v1761_v22 = vpop.f32.mrf.mxu0 }
 0xcb7   :  { %4761 = vmatmul.mubr.msk.f32.vlgmr.msra.gmra.mxu1 %vm204_vm2, %v1761_v22 }
 0xcb8   :  { %v4757_v23 = vpop.f32.mrf.mxu0  ;;  %4775 = vmatpush3.msra.mxu1 %v2021_v8  ;;  %v4410_v8 = vld [vmem:[%s5829_s4 + $0x20] sm:$0xff] }
 0xcb9   :  { %4776 = vmatprep.subr.mxu1 %v2020_v9 }
 0xcba   :  { %4777 = vmatpush3.msra.mxu1 %v2020_v9 }
 0xcbb   :  { %4778 = vmatprep.subr.mxu1 %v2019_v10 }
 0xcbc   :  { %4779 = vmatpush3.msra.mxu1 %v2019_v10 }
 0xcbd   :  { %4780 = vmatprep.subr.mxu1 %v2018_v5 }
 0xcbe   :  { %4781 = vmatpush3.msra.mxu1 %v2018_v5 }
 0xcbf   :  { %4782 = vmatprep.subr.mxu1 %v2017_v11 }
 0xcc0   :  { %4783 = vmatpush3.msra.mxu1 %v2017_v11 }
 0xcc1   :  { %4784 = vmatprep.subr.mxu1 %v2016_v12 }
 0xcc2   :  { %4785 = vmatpush3.msra.mxu1 %v2016_v12 }
 0xcc3   :  { %4786 = vmatprep.subr.mxu1 %v2015_v7 }
 0xcc4   :  { %4787 = vmatpush3.msra.mxu1 %v2015_v7 }
 0xcc5   :  { %4788 = vmatprep.subr.mxu1 %v2014_v13 }
 0xcc6   :  { %4789 = vmatpush3.msra.mxu1 %v2014_v13 }
 0xcc7   :  { %4790 = vmatprep.subr.mxu1 %v2013_v14 }
 0xcc8   :  { %4791 = vmatpush3.msra.mxu1 %v2013_v14  ;;  %v4408_v14 = vld [vmem:[%s5830_s3 + $0xa] ss:$0 sm:$0xff] }
 0xcc9   :  { %4792 = vmatprep.subr.mxu1 %v2012_v15 }
 0xcca   :  { %4793 = vmatpush3.msra.mxu1 %v2012_v15 }
 0xccb   :  { %4794 = vmatprep.subr.mxu1 %v2011_v16 }
 0xccc   :  { %4795 = vmatpush3.msra.mxu1 %v2011_v16 }
 0xccd   :  { %4796 = vmatprep.subr.mxu1 %v2010_v17 }
 0xcce   :  { %4797 = vmatpush3.msra.mxu1 %v2010_v17 }
 0xccf   :  { %4798 = vmatprep.subr.mxu1 %v2009_v40 }
 0xcd0   :  { %4799 = vmatpush3.msra.mxu1 %v2009_v40 }
 0xcd1   :  { %4800 = vmatprep.subr.mxu1 %v2008_v18 }
 0xcd2   :  { %4801 = vmatpush3.msra.mxu1 %v2008_v18  ;;  %v4409_v18 = vld [vmem:[%s5830_s3 + $0xb] ss:$0 sm:$0xff] }
 0xcd3   :  { %4802 = vmatprep.subr.mxu1 %v2007_v19 }
 0xcd4   :  { %4803 = vmatpush3.msra.mxu1 %v2007_v19 }
 0xcd5   :  { %4804 = vmatprep.subr.mxu1 %v2006_v20 }
 0xcd6   :  { %4805 = vmatpush3.msra.mxu1 %v2006_v20 }
 0xcd7   :  { %4845 = vmatprep.subr.mxu1 %v5096_v37 }
 0xd77   :  { %v4762_v24 = vpop.f32.mrf.mxu1 }
 0xd78   :  { %v1847_v26 = vadd.f32 %v4762_v24, %v1434_v1 }
 0xd79   :  { %v1837_v27 = vpop.f32.mrf.mxu1 }
 0xd7a   :  { %v1854_v28 = vadd.f32 %v4397_v25, %v1847_v26  ;;  %v1846_v29 = vadd.f32 %v1837_v27, %v1433_v3 }
 0xd7c   :  { %v1853_v30 = vadd.f32 %v4397_v25, %v1846_v29  ;;  %v1856_v31 = vadd.f32 %v1854_v28, %v5185_v36 }
 0xd7e   :  { %v1862_v32 = vsel %vm33_vm0, %v1856_v31, 0.0  ;;  %v1855_v33 = vadd.f32 %v1853_v30, %v5181_v34  ;;  %v4403_v34 = vld [vmem:[%s5829_s4 + $0x58] sm:$0xff] }
 0xd7f   :  { %1863 = vadd.xlane.f32.xlu0 %v1862_v32  ;;  %4763 = vmatprep.subr.mxu0 %v4403_v34 }
 0xd80   :  { %v1859_v35 = vsel %vm33_vm0, %v1855_v33, 0.0  ;;  %4764 = vmatpush3.msra.mxu0 %v4403_v34 }
 0xd81   :  { %1860 = vadd.xlane.f32.xlu1 %v1859_v35  ;;  %4765 = vmatprep.subr.mxu0 %v4402_v49 }
 0xd82   :  { %4766 = vmatpush3.msra.mxu0 %v4402_v49 }
 0xd83   :  { %4767 = vmatprep.subr.mxu0 %v4401_v50 }
 0xd84   :  { %4768 = vmatpush3.msra.mxu0 %v4401_v50 }
 0xd85   :  { %4769 = vmatprep.subr.mxu0 %v4400_v51 }
 0xd86   :  { %4770 = vmatpush3.msra.mxu0 %v4400_v51 }
 0xe08   :  { %v1864_v38 = vpop.xlane.xlu0 %1863 }
 0xe09   :  { %v1866_v39 = vmul.f32 0.03125, %v1864_v38 }
 0xe0a   :  { %v1861_v41 = vpop.xlane.xlu1 %1860 }
 0xe0b   :  { %v1868_v43 = vsub.f32 %v1856_v31, %v1866_v39  ;;  %v1865_v44 = vmul.f32 0.03125, %v1861_v41 }
 0xe0d   :  { %v1867_v45 = vsub.f32 %v1855_v33, %v1865_v44  ;;  %v1870_v46 = vmul.f32 %v1868_v43, %v1868_v43 }
 0xe0f   :  { %v1874_v47 = vsel %vm33_vm0, %v1870_v46, 0.0  ;;  %v1869_v48 = vmul.f32 %v1867_v45, %v1867_v45 }
 0xe10   :  { %1875 = vadd.xlane.f32.xlu1 %v1874_v47 }
 0xe11   :  { %v1871_v36 = vsel %vm33_vm0, %v1869_v48, 0.0  ;;  %v4407_v48 = vld [vmem:[%s5830_s3 + $0x9] ss:$0 sm:$0xff] }
 0xe12   :  { %1872 = vadd.xlane.f32.xlu0 %v1871_v36 }
 0xe99   :  { %v1876_v52 = vpop.xlane.xlu1 %1875 }
 0xe9a   :  { %v1878_v53 = vmul.f32 0.03125, %v1876_v52 }
 0xe9b   :  { %v1873_v54 = vpop.xlane.xlu0 %1872 }
 0xe9c   :  { %v1880_v55 = vadd.f32 1e-12, %v1878_v53  ;;  %v1877_v58 = vmul.f32 0.03125, %v1873_v54 }
 0xe9e   :  { %5038 = vrsqrt.f32 %v1880_v55  ;;  %v1879_v59 = vadd.f32 1e-12, %v1877_v58 }
 0xea0   :  { %5040 = vrsqrt.f32 %v1879_v59 }
 0xeab   :  { %v5039_v60 = vpop.eup %5038 }
 0xeac   :  { %v1884_v62 = vmul.f32 %v5039_v60, %v1868_v43 }
 0xead   :  { %v5041_v63 = vpop.eup %5040 }
 0xeae   :  { %v1883_v0 = vmul.f32 %v5041_v63, %v1867_v45  ;;  %v1890_v1 = vmul.f32 %v4398_v61, %v1884_v62 }
 0xeb0   :  { %v1889_v3 = vmul.f32 %v4398_v61, %v1883_v0  ;;  %v5406_v6 = vadd.f32 %v4399_v2, %v1890_v1 }
 0xeb2   :  { %v5404_v4 = vadd.f32 %v4399_v2, %v1889_v3  ;;  %v4413_v3 = vld [vmem:[%s5829_s4 + $0x38] sm:$0xff] }
 0xeb3   :  { %4809 = vmatprep.subr.mxu0 %v4413_v3 }
 0xeb4   :  { %4771 = vmatprep.mubr.msk.f32.mxu0 %vm33_vm0, %v5404_v4 }
 0xeb5   :  { %4772 = vmatmul.mubr.msk.f32.vlgmr.msra.gmra.mxu0 %vm33_vm0, %v5406_v6 }
 0xeb6   :  { %4810 = vmatpush3.msra.mxu0 %v4413_v3 }
 0xf75   :  { %v4773_v21 = vpop.f32.mrf.mxu0 }
 0xf76   :  { %v1985_v22 = vadd.f32 %v4773_v21, %v4404_v42  ;;  %v4414_v21 = vld [vmem:[%s5830_s3 + $0xc] ss:$0 sm:$0xff] }
 0xf77   :  { %v1979_v23 = vpop.f32.mrf.mxu0 }
 0xf78   :  { %v1991_v24 = vmul.f32 0.044715, %v1985_v22  ;;  %v1980_v25 = vadd.f32 %v4404_v42, %v1979_v23  ;;  %v1989_v45 = vmul.f32 0.5, %v1985_v22 }
 0xf7a   :  { %v1993_v26 = vmul.f32 %v1991_v24, %v1985_v22  ;;  %v1990_v27 = vmul.f32 0.044715, %v1980_v25  ;;  %v1988_v43 = vmul.f32 0.5, %v1980_v25 }
 0xf7c   :  { %v1995_v28 = vmul.f32 %v1993_v26, %v1985_v22  ;;  %v1992_v29 = vmul.f32 %v1990_v27, %v1980_v25 }
 0xf7e   :  { %v1997_v30 = vadd.f32 %v1995_v28, %v1985_v22  ;;  %v1994_v31 = vmul.f32 %v1992_v29, %v1980_v25 }
 0xf80   :  { %v1996_v32 = vadd.f32 %v1994_v31, %v1980_v25  ;;  %v1999_v33 = vmul.f32 0.7978846, %v1997_v30 }
 0xf82   :  { %v1998_v35 = vmul.f32 0.7978846, %v1996_v32  ;;  %5042 = vtanh.f32 %v1999_v33 }
 0xf84   :  { %5044 = vtanh.f32 %v1998_v35 }
 0xf8f   :  { %v5043_v38 = vpop.eup %5042 }
 0xf90   :  { %v2003_v41 = vadd.f32 1.0, %v5043_v38 }
 0xf91   :  { %v5045_v39 = vpop.eup %5044 }
 0xf92   :  { %v2002_v44 = vadd.f32 1.0, %v5045_v39  ;;  %v2005_v47 = vmul.f32 %v2003_v41, %v1989_v45 }
 0xf94   :  { %v2004_v46 = vmul.f32 %v2002_v44, %v1988_v43 }
 0xf96   :  { %4806 = vmatprep.mubr.f32.mxu1 %v2004_v46 }
 0xf97   :  { %4807 = vmatmul.mubr.f32.vlgmr.msra.gmra.mxu1 %v2005_v47 }
 0xf98   :  { %4847 = vmatprep.mubr.msk.f32.mxu1 %vm5097_vm1, %v5096_v37 }
0x1057   :  { %v4808_v36 = vpop.f32.mrf.mxu1 }
0x1058   :  { %v2099_v34 = vadd.f32 %v4808_v36, %v4407_v48 }
0x1059   :  { %v2093_v49 = vpop.f32.mrf.mxu1 }
0x105a   :  { %v2094_v50 = vadd.f32 %v4407_v48, %v2093_v49  ;;  %v2103_v51 = vadd.f32 %v2099_v34, %v5406_v6  ;;  %v4411_v6 = vld [vmem:[%s5829_s4 + $0x28] sm:$0xff] }
0x105c   :  { %v2109_v52 = vsel %vm33_vm0, %v2103_v51, 0.0  ;;  %v2102_v53 = vadd.f32 %v2094_v50, %v5404_v4  ;;  %v4412_v4 = vld [vmem:[%s5829_s4 + $0x30] sm:$0xff] }
0x105d   :  { %2110 = vadd.xlane.f32.xlu1 %v2109_v52  ;;  %4811 = vmatprep.subr.mxu0 %v4412_v4 }
0x105e   :  { %v2106_v54 = vsel %vm33_vm0, %v2102_v53, 0.0  ;;  %4812 = vmatpush3.msra.mxu0 %v4412_v4 }
0x105f   :  { %2107 = vadd.xlane.f32.xlu0 %v2106_v54  ;;  %4813 = vmatprep.subr.mxu0 %v4411_v6 }
0x1060   :  { %4814 = vmatpush3.msra.mxu0 %v4411_v6 }
0x1061   :  { %4815 = vmatprep.subr.mxu0 %v4410_v8 }
0x1062   :  { %4816 = vmatpush3.msra.mxu0 %v4410_v8 }
0x1063   :  { %4820 = vmatprep.subr.mxu0 %v5096_v37 }
0x10e6   :  { %v2111_v55 = vpop.xlane.xlu1 %2110 }
0x10e7   :  { %v2113_v58 = vmul.f32 0.03125, %v2111_v55 }
0x10e8   :  { %v2108_v59 = vpop.xlane.xlu0 %2107 }
0x10e9   :  { %v2115_v60 = vsub.f32 %v2103_v51, %v2113_v58  ;;  %v2112_v61 = vmul.f32 0.03125, %v2108_v59 }
0x10eb   :  { %v2114_v62 = vsub.f32 %v2102_v53, %v2112_v61  ;;  %v2117_v63 = vmul.f32 %v2115_v60, %v2115_v60 }
0x10ed   :  { %v2121_v0 = vsel %vm33_vm0, %v2117_v63, 0.0  ;;  %v2116_v1 = vmul.f32 %v2114_v62, %v2114_v62 }
0x10ee   :  { %2122 = vadd.xlane.f32.xlu1 %v2121_v0 }
0x10ef   :  { %v2118_v2 = vsel %vm33_vm0, %v2116_v1, 0.0 }
0x10f0   :  { %2119 = vadd.xlane.f32.xlu0 %v2118_v2 }
0x1177   :  { %v2123_v9 = vpop.xlane.xlu1 %2122 }
0x1178   :  { %v2125_v10 = vmul.f32 0.03125, %v2123_v9 }
0x1179   :  { %v2120_v5 = vpop.xlane.xlu0 %2119 }
0x117a   :  { %v2127_v11 = vadd.f32 1e-12, %v2125_v10  ;;  %v2124_v12 = vmul.f32 0.03125, %v2120_v5 }
0x117c   :  { %5046 = vrsqrt.f32 %v2127_v11  ;;  %v2126_v7 = vadd.f32 1e-12, %v2124_v12 }
0x117e   :  { %5048 = vrsqrt.f32 %v2126_v7 }
0x1189   :  { %v5047_v13 = vpop.eup %5046 }
0x118a   :  { %v2131_v15 = vmul.f32 %v5047_v13, %v2115_v60 }
0x118b   :  { %v5049_v16 = vpop.eup %5048 }
0x118c   :  { %v2130_v17 = vmul.f32 %v5049_v16, %v2114_v62  ;;  %v2137_v40 = vmul.f32 %v4408_v14, %v2131_v15 }
0x118e   :  { %v2136_v19 = vmul.f32 %v4408_v14, %v2130_v17  ;;  %v5496_v42 = vadd.f32 %v4409_v18, %v2137_v40 }
0x1190   :  { %v5494_v20 = vadd.f32 %v4409_v18, %v2136_v19 }
0x1192   :  { %4817 = vmatprep.mubr.msk.f32.mxu0 %vm33_vm0, %v5494_v20 }
0x1193   :  { %4818 = vmatmul.mubr.msk.f32.vlgmr.msra.gmra.mxu0 %vm33_vm0, %v5496_v42 }
0x1194   :  { %4822 = vmatprep.mubr.msk.f32.mxu0 %vm5097_vm1, %v5096_v37 }
0x1253   :  { %v4819_v22 = vpop.f32.mrf.mxu0 }
0x1254   :  { %v5507_v23 = vadd.f32 %v4819_v22, %v4414_v21  ;;  %v4417_v22 = vld [vmem:[%s5832_s5 + $0x20] sm:$0xff] }
0x1255   :  { %v2226_v24 = vpop.f32.mrf.mxu0 }
0x1256   :  { %v5509_v25 = vadd.f32 %v4414_v21, %v2226_v24  ;;  %2318 = vrot.lane.b32.xlu1 %v5507_v23, %s5098_s19 }
0x1258   :  { %2241 = vrot.lane.b32.xlu0 %v5509_v25, %s5098_s19 }
0x12c8   :  { %v2319_v27 = vpop.permute.xlu1 %2318 }
0x12ca   :  { %v2242_v26 = vpop.permute.xlu0 %2241 }
0x12cb   :  { %4821 = vmatpush3.xpose.msk.msra.mxu0 %vm204_vm2, %v2242_v26 }
0x12cc   :  { %4825 = vmatprep.subr.mxu0 %v5096_v37 }
0x12ce   :  { %4823 = vmatmul.mubr.msk.f32.vlgmr.msra.gmra.mxu0 %vm204_vm2, %v5509_v25 }
0x12cf   :  { %4826 = vmatpush3.xpose.msk.msra.mxu0 %vm204_vm2, %v2319_v27  ;;  %4827 = vmatprep.mubr.msk.f32.mxu0 %vm5097_vm1, %v5096_v37 }
0x12d0   :  { %4830 = vmatprep.subr.mxu0 %v5096_v37 }
0x12d2   :  { %4828 = vmatmul.mubr.msk.f32.vlgmr.msra.gmra.mxu0 %vm204_vm2, %v5507_v23 }
0x12d3   :  { %4832 = vmatprep.mubr.msk.f32.mxu0 %vm5097_vm1, %v5096_v37 }
0x138e   :  { %v2313_v28 = vpop.f32.mrf.mxu0 }
0x138f   :  { %v2314_v29 = vadd.f32 %v2313_v28, %v5223_v57 }
0x1390   :  { %v4824_v30 = vpop.f32.mrf.mxu0 }
0x1391   :  { %v2394_v31 = vsel %vm204_vm2, %v2314_v29, -inf }
0x1392   :  { %2395 = vmax.xlane.f32.xlu1 %v2394_v31  ;;  %v2390_v32 = vpop.f32.mrf.mxu0 }
0x1393   :  { %v2391_v33 = vadd.f32 %v2390_v32, %v5221_v56 }
0x1394   :  { %v4829_v35 = vpop.f32.mrf.mxu0 }
0x1395   :  { %v2397_v38 = vsel %vm204_vm2, %v2391_v33, -inf }
0x1396   :  { %2398 = vmax.xlane.f32.xlu0 %v2397_v38  ;;  %v4418_v38 = vld [vmem:[%s5832_s5 + $0x28] sm:$0xff] }
0x13a3   :  { %2492 = vrot.lane.b32.xlu1 %v5507_v23, %s5100_s2 }
0x13a7   :  { %2570 = vrot.lane.b32.xlu1 %v5509_v25, %s5101_s22 }
0x13ab   :  { %2648 = vrot.lane.b32.xlu1 %v5507_v23, %s5101_s22 }
0x141b   :  { %v2396_v39 = vpop.xlane.xlu1 %2395 }
0x141c   :  { %v2400_v41 = vsub.f32 %v2314_v29, %v2396_v39 }
0x141e   :  { %v2402_v43 = vmul.f32 1.442695, %v2400_v41 }
0x141f   :  { %v2493_v44 = vpop.permute.xlu1 %2492  ;;  %v2399_v45 = vpop.xlane.xlu0 %2398 }
0x1420   :  { %5050 = vpow2.f32 %v2402_v43  ;;  %v2401_v46 = vsub.f32 %v2391_v33, %v2399_v45 }
0x1422   :  { %v2404_v47 = vmul.f32 1.442695, %v2401_v46 }
0x1423   :  { %v2571_v48 = vpop.permute.xlu1 %2570 }
0x1424   :  { %5052 = vpow2.f32 %v2404_v47 }
0x1427   :  { %v2649_v36 = vpop.permute.xlu1 %2648 }
0x1428   :  { %4846 = vmatpush3.xpose.msk.msra.mxu1 %vm204_vm2, %v2649_v36 }
0x1429   :  { %4855 = vmatprep.subr.mxu1 %v5096_v37 }
0x142d   :  { %v5051_v34 = vpop.eup %5050 }
0x142e   :  { %v2406_v49 = vsel %vm204_vm2, %v5051_v34, 0.0 }
0x142f   :  { %2407 = vadd.xlane.f32.xlu0 %v2406_v49 }
0x1431   :  { %v5053_v50 = vpop.eup %5052 }
0x1432   :  { %v2409_v51 = vsel %vm204_vm2, %v5053_v50, 0.0 }
0x1433   :  { %2410 = vadd.xlane.f32.xlu1 %v2409_v51 }
0x1444   :  { %2646 = vrot.lane.b32.xlu1 %v5507_v23, %s5102_s23 }
0x1445   :  { %2416 = vrot.lane.b32.xlu0 %v5509_v25, %s5100_s2 }
0x1449   :  { %2568 = vrot.lane.b32.xlu0 %v5509_v25, %s5102_s23 }
0x14b8   :  { %v2408_v52 = vpop.xlane.xlu0 %2407 }
0x14b9   :  { %5054 = vrcp.f32 %v2408_v52 }
0x14bc   :  { %v2411_v53 = vpop.xlane.xlu1 %2410  ;;  %v2417_v54 = vpop.permute.xlu0 %2416 }
0x14bd   :  { %5056 = vrcp.f32 %v2411_v53  ;;  %4831 = vmatpush3.msra.mxu0 %v2417_v54 }
0x14be   :  { %4835 = vmatprep.subr.mxu0 %v5096_v37 }
0x14c0   :  { %v2647_v55 = vpop.permute.xlu1 %2646  ;;  %v2569_v62 = vpop.permute.xlu0 %2568 }
0x14c1   :  { %4848 = vmatmul.mubr.msk.f32.vlgmr.msra.gmra.mxu1 %vm204_vm2, %v2647_v55 }
0x14c2   :  { %4857 = vmatprep.mubr.msk.f32.mxu1 %vm5097_vm1, %v5096_v37 }
0x14c6   :  { %v5055_v58 = vpop.eup %5054 }
0x14c7   :  { %v2414_v59 = vmul.f32 %v5055_v58, %v5051_v34 }
0x14c9   :  { %4833 = vmatmul.mubr.msk.f32.vlgmr.msra.gmra.mxu0 %vm204_vm2, %v2414_v59 }
0x14ca   :  { %v5057_v60 = vpop.eup %5056  ;;  %4836 = vmatpush3.msra.mxu0 %v2493_v44  ;;  %4837 = vmatprep.mubr.msk.f32.mxu0 %vm5097_vm1, %v5096_v37 }
0x14cb   :  { %4840 = vmatprep.subr.mxu0 %v5096_v37  ;;  %v2415_v61 = vmul.f32 %v5057_v60, %v5053_v50 }
0x14cd   :  { %4838 = vmatmul.mubr.msk.f32.vlgmr.msra.gmra.mxu0 %vm204_vm2, %v2415_v61 }
0x14ce   :  { %4841 = vmatpush3.xpose.msk.msra.mxu0 %vm204_vm2, %v2571_v48  ;;  %4842 = vmatprep.mubr.msk.f32.mxu0 %vm5097_vm1, %v5096_v37 }
0x14cf   :  { %4850 = vmatprep.subr.mxu0 %v5096_v37 }
0x14d1   :  { %4843 = vmatmul.mubr.msk.f32.vlgmr.msra.gmra.mxu0 %vm204_vm2, %v2569_v62 }
0x14d2   :  { %4852 = vmatprep.mubr.msk.f32.mxu0 %vm5097_vm1, %v5096_v37 }
0x1581   :  { %v2720_v63 = vpop.f32.mrf.mxu1 }
0x1582   :  { %v2721_v0 = vadd.f32 %v2720_v63, %v5221_v56 }
0x1583   :  { %v4849_v1 = vpop.f32.mrf.mxu1 }
0x1584   :  { %v2727_v2 = vsel %vm204_vm2, %v2721_v0, -inf }
0x1585   :  { %2728 = vmax.xlane.f32.xlu1 %v2727_v2 }
0x1589   :  { %v2488_v3 = vpop.f32.mrf.mxu0 }
0x158b   :  { %v4834_v4 = vpop.f32.mrf.mxu0 }
0x158d   :  { %v2564_v6 = vpop.f32.mrf.mxu0 }
0x158f   :  { %v4839_v8 = vpop.f32.mrf.mxu0 }
0x1591   :  { %v2642_v9 = vpop.f32.mrf.mxu0 }
0x1592   :  { %v2643_v10 = vadd.f32 %v2642_v9, %v5223_v57 }
0x1593   :  { %v4844_v5 = vpop.f32.mrf.mxu0 }
0x1594   :  { %v2724_v11 = vsel %vm204_vm2, %v2643_v10, -inf }
0x1595   :  { %2725 = vmax.xlane.f32.xlu0 %v2724_v11 }
0x1596   :  { %2822 = vrot.lane.b32.xlu1 %v5507_v23, %s5103_s24 }
0x159a   :  { %3062 = vrot.lane.b32.xlu1 %v5509_v25, %s5104_s25 }
0x159e   :  { %3140 = vrot.lane.b32.xlu1 %v5507_v23, %s5104_s25 }
0x15a2   :  { %3138 = vrot.lane.b32.xlu1 %v5507_v23, %s5105_s26 }
0x160e   :  { %v2729_v12 = vpop.xlane.xlu1 %2728 }
0x160f   :  { %v2731_v7 = vsub.f32 %v2721_v0, %v2729_v12 }
0x1611   :  { %v2734_v13 = vmul.f32 1.442695, %v2731_v7 }
0x1612   :  { %v2823_v14 = vpop.permute.xlu1 %2822 }
0x1613   :  { %5058 = vpow2.f32 %v2734_v13  ;;  %4856 = vmatpush3.msra.mxu1 %v2823_v14 }
0x1614   :  { %4865 = vmatprep.subr.mxu1 %v4417_v22 }
0x1616   :  { %v3063_v26 = vpop.permute.xlu1 %3062 }
0x161a   :  { %v3141_v30 = vpop.permute.xlu1 %3140 }
0x161e   :  { %v2726_v15 = vpop.xlane.xlu0 %2725  ;;  %v3139_v32 = vpop.permute.xlu1 %3138 }
0x161f   :  { %v2730_v16 = vsub.f32 %v2643_v10, %v2726_v15 }
0x1620   :  { %v5059_v17 = vpop.eup %5058 }
0x1621   :  { %v2732_v40 = vmul.f32 1.442695, %v2730_v16  ;;  %v2739_v18 = vsel %vm204_vm2, %v5059_v17, 0.0  ;;  %v4419_v16 = vld [vmem:[%s5832_s5 + $0x30] sm:$0xff] }
0x1622   :  { %2740 = vadd.xlane.f32.xlu0 %v2739_v18 }
0x1623   :  { %5060 = vpow2.f32 %v2732_v40 }
0x1630   :  { %v5061_v19 = vpop.eup %5060 }
0x1631   :  { %v2736_v21 = vsel %vm204_vm2, %v5061_v19, 0.0 }
0x1632   :  { %2737 = vadd.xlane.f32.xlu0 %v2736_v21 }
0x1648   :  { %2746 = vrot.lane.b32.xlu0 %v5509_v25, %s5103_s24 }
0x164c   :  { %3060 = vrot.lane.b32.xlu0 %v5509_v25, %s5105_s26 }
0x16ab   :  { %v2741_v24 = vpop.xlane.xlu0 %2740 }
0x16ac   :  { %5062 = vrcp.f32 %v2741_v24 }
0x16b9   :  { %v5063_v27 = vpop.eup %5062 }
0x16ba   :  { %v2745_v28 = vmul.f32 %v5063_v27, %v5059_v17 }
0x16bb   :  { %v2738_v29 = vpop.xlane.xlu0 %2737 }
0x16bc   :  { %5064 = vrcp.f32 %v2738_v29  ;;  %4858 = vmatmul.mubr.msk.f32.vlgmr.msra.gmra.mxu1 %vm204_vm2, %v2745_v28 }
0x16bd   :  { %4867 = vmatprep.mubr.msk.f32.mxu1 %vm204_vm2, %v2488_v3  ;;  %4866 = vmatpush3.msra.mxu1 %v4417_v22 }
0x16be   :  { %4875 = vmatprep.subr.mxu1 %v5096_v37 }
0x16bf   :  { %v2747_v31 = vpop.permute.xlu0 %2746 }
0x16c0   :  { %4851 = vmatpush3.msra.mxu0 %v2747_v31  ;;  %4868 = vmatmul.mubr.msk.f32.vlgmr.msra.gmra.mxu1 %vm204_vm2, %v2564_v6 }
0x16c1   :  { %4876 = vmatpush3.xpose.msk.msra.mxu1 %vm204_vm2, %v3141_v30  ;;  %4877 = vmatprep.mubr.msk.f32.mxu1 %vm5097_vm1, %v5096_v37 }
0x16c2   :  { %4885 = vmatprep.subr.mxu1 %v5096_v37  ;;  %4860 = vmatprep.subr.mxu0 %v4418_v38 }
0x16c3   :  { %v3061_v49 = vpop.permute.xlu0 %3060 }
0x16c4   :  { %4878 = vmatmul.mubr.msk.f32.vlgmr.msra.gmra.mxu1 %vm204_vm2, %v3139_v32 }
0x16c5   :  { %4887 = vmatprep.mubr.msk.f32.mxu1 %vm5097_vm1, %v5096_v37 }
0x16c9   :  { %v5065_v33 = vpop.eup %5064 }
0x16ca   :  { %v2744_v35 = vmul.f32 %v5065_v33, %v5061_v19 }
0x16cc   :  { %4853 = vmatmul.mubr.msk.f32.vlgmr.msra.gmra.mxu0 %vm204_vm2, %v2744_v35 }
0x16cd   :  { %4861 = vmatpush3.msra.mxu0 %v4418_v38 }
0x16ce   :  { %4870 = vmatprep.subr.mxu0 %v5096_v37 }
0x177c   :  { %v2894_v39 = vpop.f32.mrf.mxu1 }
0x177e   :  { %v4859_v41 = vpop.f32.mrf.mxu1 }
0x1780   :  { %v5600_v43 = vpop.f32.mrf.mxu1 }
0x1782   :  { %v5602_v44 = vpop.f32.mrf.mxu1 }
0x1784   :  { %v3212_v45 = vpop.f32.mrf.mxu1 }
0x1785   :  { %v3213_v46 = vadd.f32 %v3212_v45, %v5221_v56 }
0x1786   :  { %v4879_v47 = vpop.f32.mrf.mxu1 }
0x1787   :  { %v3219_v48 = vsel %vm204_vm2, %v3213_v46, -inf }
0x1788   :  { %3220 = vmax.xlane.f32.xlu1 %v3219_v48 }
0x178c   :  { %v2818_v36 = vpop.f32.mrf.mxu0 }
0x178d   :  { %4862 = vmatprep.mubr.msk.f32.mxu0 %vm204_vm2, %v2818_v36 }
0x178e   :  { %v4854_v34 = vpop.f32.mrf.mxu0  ;;  %4863 = vmatmul.mubr.msk.f32.vlgmr.msra.gmra.mxu0 %vm204_vm2, %v2894_v39 }
0x178f   :  { %4871 = vmatpush3.xpose.msk.msra.mxu0 %vm204_vm2, %v3063_v26  ;;  %4872 = vmatprep.mubr.msk.f32.mxu0 %vm5097_vm1, %v5096_v37 }
0x1790   :  { %4880 = vmatprep.subr.mxu0 %v5096_v37 }
0x1792   :  { %4873 = vmatmul.mubr.msk.f32.vlgmr.msra.gmra.mxu0 %vm204_vm2, %v3061_v49 }
0x1793   :  { %4882 = vmatprep.mubr.msk.f32.mxu0 %vm5097_vm1, %v5096_v37 }
0x1799   :  { %3314 = vrot.lane.b32.xlu1 %v5507_v23, %s5106_s1 }
0x179d   :  { %3475 = vrot.lane.b32.xlu1 %v5509_v25, %s5107_s30 }
0x17a1   :  { %3553 = vrot.lane.b32.xlu1 %v5507_v23, %s5107_s30 }
0x17a5   :  { %3551 = vrot.lane.b32.xlu1 %v5507_v23, %s5108_s8 }
0x1811   :  { %v3221_v50 = vpop.xlane.xlu1 %3220 }
0x1812   :  { %v3223_v52 = vsub.f32 %v3213_v46, %v3221_v50 }
0x1814   :  { %v3226_v53 = vmul.f32 1.442695, %v3223_v52 }
0x1815   :  { %v3315_v51 = vpop.permute.xlu1 %3314 }
0x1816   :  { %4886 = vmatpush3.msra.mxu1 %v3315_v51  ;;  %5066 = vpow2.f32 %v3226_v53 }
0x1817   :  { %4895 = vmatprep.subr.mxu1 %v5096_v37 }
0x1819   :  { %v3476_v10 = vpop.permute.xlu1 %3475 }
0x181d   :  { %v3554_v21 = vpop.permute.xlu1 %3553 }
0x1821   :  { %v3552_v26 = vpop.permute.xlu1 %3551 }
0x1823   :  { %v5067_v62 = vpop.eup %5066 }
0x1824   :  { %v3231_v63 = vsel %vm204_vm2, %v5067_v62, 0.0 }
0x184e   :  { %v5624_v54 = vpop.f32.mrf.mxu0 }
0x184f   :  { %v3057_v31 = vadd.f32 %v5600_v43, %v5624_v54 }
0x1850   :  { %v5626_v55 = vpop.f32.mrf.mxu0 }
0x1851   :  { %v3052_v33 = vadd.f32 %v5602_v44, %v5626_v55  ;;  %v4420_v55 = vld [vmem:[%s5832_s5 + $0x38] sm:$0xff] }
0x1852   :  { %v3134_v58 = vpop.f32.mrf.mxu0 }
0x1853   :  { %v3135_v59 = vadd.f32 %v3134_v58, %v5223_v57 }
0x1854   :  { %v4874_v60 = vpop.f32.mrf.mxu0 }
0x1855   :  { %v3216_v61 = vsel %vm204_vm2, %v3135_v59, -inf }
0x1856   :  { %3217 = vmax.xlane.f32.xlu0 %v3216_v61 }
0x185a   :  { %3232 = vadd.xlane.f32.xlu0 %v3231_v63 }
0x18df   :  { %v3218_v0 = vpop.xlane.xlu0 %3217 }
0x18e0   :  { %v3222_v1 = vsub.f32 %v3135_v59, %v3218_v0 }
0x18e2   :  { %v3224_v2 = vmul.f32 1.442695, %v3222_v1 }
0x18e3   :  { %v3233_v3 = vpop.xlane.xlu0 %3232 }
0x18e4   :  { %5068 = vpow2.f32 %v3224_v2 }
0x18e5   :  { %5070 = vrcp.f32 %v3233_v3 }
0x18f1   :  { %v5069_v4 = vpop.eup %5068 }
0x18f2   :  { %v5071_v6 = vpop.eup %5070  ;;  %v3228_v8 = vsel %vm204_vm2, %v5069_v4, 0.0 }
0x18f3   :  { %3229 = vadd.xlane.f32.xlu0 %v3228_v8  ;;  %v3237_v9 = vmul.f32 %v5071_v6, %v5067_v62  ;;  %v4453_v62 = vld [vmem:[%s5830_s3 + $0xd] ss:$0 sm:$0xff] }
0x18f5   :  { %4888 = vmatmul.mubr.msk.f32.vlgmr.msra.gmra.mxu1 %vm204_vm2, %v3237_v9 }
0x18f6   :  { %4896 = vmatpush3.xpose.msk.msra.mxu1 %vm204_vm2, %v3476_v10  ;;  %4897 = vmatprep.mubr.msk.f32.mxu1 %vm5097_vm1, %v5096_v37 }
0x18f7   :  { %4905 = vmatprep.subr.mxu1 %v5096_v37 }
0x1909   :  { %3238 = vrot.lane.b32.xlu0 %v5509_v25, %s5106_s1 }
0x190d   :  { %3473 = vrot.lane.b32.xlu0 %v5509_v25, %s5108_s8 }
0x197c   :  { %v3230_v5 = vpop.xlane.xlu0 %3229 }
0x197d   :  { %5072 = vrcp.f32 %v3230_v5 }
0x1980   :  { %v3239_v11 = vpop.permute.xlu0 %3238 }
0x1981   :  { %4881 = vmatpush3.msra.mxu0 %v3239_v11 }
0x1982   :  { %4890 = vmatprep.subr.mxu0 %v4419_v16 }
0x1984   :  { %v3474_v12 = vpop.permute.xlu0 %3473 }
0x1985   :  { %4898 = vmatmul.mubr.msk.f32.vlgmr.msra.gmra.mxu1 %vm204_vm2, %v3474_v12 }
0x1986   :  { %4907 = vmatprep.mubr.msk.f32.mxu1 %vm5097_vm1, %v5096_v37 }
0x198a   :  { %v5073_v7 = vpop.eup %5072 }
0x198b   :  { %v3236_v13 = vmul.f32 %v5073_v7, %v5069_v4 }
0x198d   :  { %4883 = vmatmul.mubr.msk.f32.vlgmr.msra.gmra.mxu0 %vm204_vm2, %v3236_v13 }
0x198e   :  { %4891 = vmatpush3.msra.mxu0 %v4419_v16 }
0x198f   :  { %4900 = vmatprep.subr.mxu0 %v5096_v37 }
0x19b5   :  { %v3386_v14 = vpop.f32.mrf.mxu1 }
0x19b7   :  { %v4889_v15 = vpop.f32.mrf.mxu1 }
0x1a45   :  { %v3547_v17 = vpop.f32.mrf.mxu1 }
0x1a46   :  { %v3548_v40 = vadd.f32 %v3547_v17, %v5223_v57  ;;  %v4458_v17 = vld [vmem:[%s5829_s4 + $0x70] sm:$0xff] }
0x1a47   :  { %v4899_v18 = vpop.f32.mrf.mxu1 }
0x1a48   :  { %v3629_v19 = vsel %vm204_vm2, %v3548_v40, -inf  ;;  %v4456_v18 = vld [vmem:[%s5829_s4 + $0x60] sm:$0xff] }
0x1a49   :  { %3630 = vmax.xlane.f32.xlu0 %v3629_v19 }
0x1a4d   :  { %v3310_v22 = vpop.f32.mrf.mxu0 }
0x1a4e   :  { %4892 = vmatprep.mubr.msk.f32.mxu0 %vm204_vm2, %v3310_v22 }
0x1a4f   :  { %v4884_v24 = vpop.f32.mrf.mxu0  ;;  %4893 = vmatmul.mubr.msk.f32.vlgmr.msra.gmra.mxu0 %vm204_vm2, %v3386_v14 }
0x1a50   :  { %4901 = vmatpush3.xpose.msk.msra.mxu0 %vm204_vm2, %v3554_v21  ;;  %4902 = vmatprep.mubr.msk.f32.mxu0 %vm5097_vm1, %v5096_v37 }
0x1a51   :  { %4910 = vmatprep.subr.mxu0 %v5096_v37 }
0x1a53   :  { %4903 = vmatmul.mubr.msk.f32.vlgmr.msra.gmra.mxu0 %vm204_vm2, %v3552_v26 }
0x1a54   :  { %4912 = vmatprep.mubr.msk.f32.mxu0 %vm5097_vm1, %v5096_v37 }
0x1ad2   :  { %v3631_v57 = vpop.xlane.xlu0 %3630 }
0x1ad3   :  { %v3635_v27 = vsub.f32 %v3548_v40, %v3631_v57  ;;  %v4457_v40 = vld [vmem:[%s5829_s4 + $0x68] sm:$0xff] }
0x1ad5   :  { %v3637_v28 = vmul.f32 1.442695, %v3635_v27 }
0x1ad7   :  { %5074 = vpow2.f32 %v3637_v28  ;;  %v4454_v28 = vld [vmem:[%s5830_s3 + $0xe] ss:$0 sm:$0xff] }
0x1ae4   :  { %v5075_v29 = vpop.eup %5074 }
0x1ae5   :  { %v3641_v30 = vsel %vm204_vm2, %v5075_v29, 0.0 }
0x1ae6   :  { %3642 = vadd.xlane.f32.xlu0 %v3641_v30 }
0x1b0f   :  { %v4894_v32 = vpop.f32.mrf.mxu0 }
0x1b10   :  { %v3472_v35 = vadd.f32 %v4894_v32, %v3057_v31 }
0x1b11   :  { %v3462_v38 = vpop.f32.mrf.mxu0 }
0x1b12   :  { %v3471_v39 = vadd.f32 %v3462_v38, %v3052_v33  ;;  %v4455_v33 = vld [vmem:[%s5830_s3 + $0xf] ss:$0 sm:$0xff] }
0x1b13   :  { %v3625_v41 = vpop.f32.mrf.mxu0 }
0x1b14   :  { %v3626_v45 = vadd.f32 %v3625_v41, %v5221_v56  ;;  %v4478_v41 = vld [vmem:[%s5833_s6 + $0xf8] sm:$0xff] }
0x1b15   :  { %v4904_v46 = vpop.f32.mrf.mxu0 }
0x1b16   :  { %v3632_v47 = vsel %vm204_vm2, %v3626_v45, -inf  ;;  %v4476_v46 = vld [vmem:[%s5833_s6 + $0xe8] sm:$0xff] }
0x1b17   :  { %3633 = vmax.xlane.f32.xlu1 %v3632_v47  ;;  %v4475_v47 = vld [vmem:[%s5833_s6 + $0xe0] sm:$0xff] }
0x1b28   :  { %3727 = vrot.lane.b32.xlu1 %v5507_v23, %s5109_s11 }
0x1b6f   :  { %v3643_v56 = vpop.xlane.xlu0 %3642 }
0x1ba0   :  { %v3634_v48 = vpop.xlane.xlu1 %3633 }
0x1ba1   :  { %v3636_v36 = vsub.f32 %v3626_v45, %v3634_v48  ;;  %v4477_v45 = vld [vmem:[%s5833_s6 + $0xf0] sm:$0xff]  ;;  %v4474_v48 = vld [vmem:[%s5833_s6 + $0xd8] sm:$0xff] }
0x1ba3   :  { %v3639_v43 = vmul.f32 1.442695, %v3636_v36  ;;  %v4473_v36 = vld [vmem:[%s5833_s6 + $0xd0] sm:$0xff] }
0x1ba4   :  { %v3728_v34 = vpop.permute.xlu1 %3727 }
0x1ba5   :  { %5076 = vpow2.f32 %v3639_v43  ;;  %4911 = vmatpush3.msra.mxu0 %v3728_v34  ;;  %v4472_v43 = vld [vmem:[%s5833_s6 + $0xc8] sm:$0xff]  ;;  %v4471_v34 = vld [vmem:[%s5833_s6 + $0xc0] sm:$0xff] }
0x1ba6   :  { %5078 = vrcp.f32 %v3643_v56  ;;  %v4468_v56 = vld [vmem:[%s5833_s6 + $0xa8] sm:$0xff] }
0x1bb2   :  { %v5077_v44 = vpop.eup %5076 }
0x1bb3   :  { %v3644_v49 = vsel %vm204_vm2, %v5077_v44, 0.0  ;;  %v5079_v51 = vpop.eup %5078 }
0x1bb4   :  { %3645 = vadd.xlane.f32.xlu0 %v3644_v49  ;;  %v3649_v23 = vmul.f32 %v5079_v51, %v5075_v29  ;;  %v4469_v49 = vld [vmem:[%s5833_s6 + $0xb0] sm:$0xff]  ;;  %v4466_v51 = vld [vmem:[%s5833_s6 + $0x98] sm:$0xff] }
0x1bca   :  { %3651 = vrot.lane.b32.xlu0 %v5509_v25, %s5109_s11 }
0x1c3d   :  { %v3646_v50 = vpop.xlane.xlu0 %3645 }
0x1c3e   :  { %5080 = vrcp.f32 %v3646_v50  ;;  %v4467_v50 = vld [vmem:[%s5833_s6 + $0xa0] sm:$0xff] }
0x1c41   :  { %v3652_v52 = vpop.permute.xlu0 %3651 }
0x1c42   :  { %4906 = vmatpush3.msra.mxu1 %v3652_v52  ;;  %v4465_v52 = vld [vmem:[%s5833_s6 + $0x90] sm:$0xff] }
0x1c43   :  { %4908 = vmatmul.mubr.msk.f32.vlgmr.msra.gmra.mxu1 %vm204_vm2, %v3649_v23  ;;  %4915 = vmatprep.subr.mxu1 %v4420_v55  ;;  %v4464_v23 = vld [vmem:[%s5833_s6 + $0x88] sm:$0xff] }
0x1c44   :  { %4916 = vmatpush3.msra.mxu1 %v4420_v55 }
0x1c45   :  { %4931 = vmatprep.subr.mxu1 %v4478_v41 }
0x1c4b   :  { %v5081_v53 = vpop.eup %5080 }
0x1c4c   :  { %v3650_v54 = vmul.f32 %v5081_v53, %v5077_v44  ;;  %v4470_v44 = vld [vmem:[%s5833_s6 + $0xb8] sm:$0xff]  ;;  %v4463_v53 = vld [vmem:[%s5833_s6 + $0x80] sm:$0xff] }
0x1c4e   :  { %4913 = vmatmul.mubr.msk.f32.vlgmr.msra.gmra.mxu0 %vm204_vm2, %v3650_v54  ;;  %v4460_v54 = vld [vmem:[%s5830_s3 + $0x10] ss:$0 sm:$0xff] }
0x1d03   :  { %v3723_v25 = vpop.f32.mrf.mxu1 }
0x1d04   :  { %4917 = vmatprep.mubr.msk.f32.mxu1 %vm204_vm2, %v3723_v25 }
0x1d05   :  { %v4909_v58 = vpop.f32.mrf.mxu1 }
0x1d0e   :  { %v3799_v59 = vpop.f32.mrf.mxu0 }
0x1d0f   :  { %4918 = vmatmul.mubr.msk.f32.vlgmr.msra.gmra.mxu1 %vm204_vm2, %v3799_v59 }
0x1d10   :  { %v4914_v60 = vpop.f32.mrf.mxu0  ;;  %4932 = vmatpush3.msra.mxu1 %v4478_v41 }
0x1d11   :  { %4933 = vmatprep.subr.mxu1 %v4477_v45 }
0x1d12   :  { %4934 = vmatpush3.msra.mxu1 %v4477_v45 }
0x1d13   :  { %4935 = vmatprep.subr.mxu1 %v4476_v46 }
0x1d14   :  { %4936 = vmatpush3.msra.mxu1 %v4476_v46 }
0x1d15   :  { %4937 = vmatprep.subr.mxu1 %v4475_v47 }
0x1d16   :  { %4938 = vmatpush3.msra.mxu1 %v4475_v47 }
0x1d17   :  { %4939 = vmatprep.subr.mxu1 %v4474_v48 }
0x1d18   :  { %4940 = vmatpush3.msra.mxu1 %v4474_v48 }
0x1d19   :  { %4941 = vmatprep.subr.mxu1 %v4473_v36 }
0x1d1a   :  { %4942 = vmatpush3.msra.mxu1 %v4473_v36 }
0x1d1b   :  { %4943 = vmatprep.subr.mxu1 %v4472_v43 }
0x1d1c   :  { %4944 = vmatpush3.msra.mxu1 %v4472_v43  ;;  %v4480_v43 = vld [vmem:[%s5830_s3 + $0x12] ss:$0 sm:$0xff] }
0x1d1d   :  { %4945 = vmatprep.subr.mxu1 %v4471_v34 }
0x1d1e   :  { %4946 = vmatpush3.msra.mxu1 %v4471_v34 }
0x1d1f   :  { %4947 = vmatprep.subr.mxu1 %v4470_v44 }
0x1d20   :  { %4948 = vmatpush3.msra.mxu1 %v4470_v44 }
0x1d21   :  { %4949 = vmatprep.subr.mxu1 %v4469_v49 }
0x1d22   :  { %4950 = vmatpush3.msra.mxu1 %v4469_v49  ;;  %v4481_v49 = vld [vmem:[%s5830_s3 + $0x13] ss:$0 sm:$0xff] }
0x1d23   :  { %4951 = vmatprep.subr.mxu1 %v4468_v56 }
0x1d24   :  { %4952 = vmatpush3.msra.mxu1 %v4468_v56 }
0x1d25   :  { %4953 = vmatprep.subr.mxu1 %v4467_v50 }
0x1d26   :  { %4954 = vmatpush3.msra.mxu1 %v4467_v50 }
0x1d27   :  { %4955 = vmatprep.subr.mxu1 %v4466_v51 }
0x1d28   :  { %4956 = vmatpush3.msra.mxu1 %v4466_v51 }
0x1d29   :  { %4957 = vmatprep.subr.mxu1 %v4465_v52 }
0x1d2a   :  { %4958 = vmatpush3.msra.mxu1 %v4465_v52 }
0x1d2b   :  { %4959 = vmatprep.subr.mxu1 %v4464_v23 }
0x1d2c   :  { %4960 = vmatpush3.msra.mxu1 %v4464_v23 }
0x1d2d   :  { %4961 = vmatprep.subr.mxu1 %v4463_v53 }
0x1d2e   :  { %4962 = vmatpush3.msra.mxu1 %v4463_v53 }
0x1dcf   :  { %v4919_v61 = vpop.f32.mrf.mxu1 }
0x1dd0   :  { %v3885_v63 = vadd.f32 %v4919_v61, %v3472_v35 }
0x1dd1   :  { %v3875_v0 = vpop.f32.mrf.mxu1 }
0x1dd2   :  { %v3892_v1 = vadd.f32 %v4453_v62, %v3885_v63  ;;  %v3884_v2 = vadd.f32 %v3875_v0, %v3471_v39 }
0x1dd4   :  { %v3891_v3 = vadd.f32 %v4453_v62, %v3884_v2  ;;  %v3894_v4 = vadd.f32 %v3892_v1, %v5496_v42 }
0x1dd6   :  { %v3900_v6 = vsel %vm33_vm0, %v3894_v4, 0.0  ;;  %v3893_v8 = vadd.f32 %v3891_v3, %v5494_v20  ;;  %v4459_v20 = vld [vmem:[%s5829_s4 + $0x78] sm:$0xff] }
0x1dd7   :  { %3901 = vadd.xlane.f32.xlu0 %v3900_v6  ;;  %4920 = vmatprep.subr.mxu0 %v4459_v20 }
0x1dd8   :  { %v3897_v9 = vsel %vm33_vm0, %v3893_v8, 0.0  ;;  %4921 = vmatpush3.msra.mxu0 %v4459_v20 }
0x1dd9   :  { %3898 = vadd.xlane.f32.xlu1 %v3897_v9  ;;  %4922 = vmatprep.subr.mxu0 %v4458_v17 }
0x1dda   :  { %4923 = vmatpush3.msra.mxu0 %v4458_v17 }
0x1ddb   :  { %4924 = vmatprep.subr.mxu0 %v4457_v40 }
0x1ddc   :  { %4925 = vmatpush3.msra.mxu0 %v4457_v40 }
0x1ddd   :  { %4926 = vmatprep.subr.mxu0 %v4456_v18 }
0x1dde   :  { %4927 = vmatpush3.msra.mxu0 %v4456_v18 }
0x1ddf   :  { %4966 = vmatprep.subr.mxu0 %v5096_v37 }
0x1e60   :  { %v3902_v10 = vpop.xlane.xlu0 %3901 }
0x1e61   :  { %v3904_v5 = vmul.f32 0.03125, %v3902_v10 }
0x1e62   :  { %v3899_v11 = vpop.xlane.xlu1 %3898 }
0x1e63   :  { %v3906_v12 = vsub.f32 %v3894_v4, %v3904_v5  ;;  %v3903_v7 = vmul.f32 0.03125, %v3899_v11 }
0x1e65   :  { %v3905_v13 = vsub.f32 %v3893_v8, %v3903_v7  ;;  %v3908_v14 = vmul.f32 %v3906_v12, %v3906_v12 }
0x1e67   :  { %v3912_v15 = vsel %vm33_vm0, %v3908_v14, 0.0  ;;  %v3907_v16 = vmul.f32 %v3905_v13, %v3905_v13  ;;  %v4479_v14 = vld [vmem:[%s5830_s3 + $0x11] ss:$0 sm:$0xff] }
0x1e68   :  { %3913 = vadd.xlane.f32.xlu1 %v3912_v15 }
0x1e69   :  { %v3909_v42 = vsel %vm33_vm0, %v3907_v16, 0.0 }
0x1e6a   :  { %3910 = vadd.xlane.f32.xlu0 %v3909_v42 }
0x1ef1   :  { %v3914_v19 = vpop.xlane.xlu1 %3913 }
0x1ef2   :  { %v3916_v21 = vmul.f32 0.03125, %v3914_v19 }
0x1ef3   :  { %v3911_v22 = vpop.xlane.xlu0 %3910 }
0x1ef4   :  { %v3918_v24 = vadd.f32 1e-12, %v3916_v21  ;;  %v3915_v26 = vmul.f32 0.03125, %v3911_v22 }
0x1ef6   :  { %5082 = vrsqrt.f32 %v3918_v24  ;;  %v3917_v57 = vadd.f32 1e-12, %v3915_v26 }
0x1ef8   :  { %5084 = vrsqrt.f32 %v3917_v57 }
0x1f03   :  { %v5083_v27 = vpop.eup %5082 }
0x1f04   :  { %v3922_v29 = vmul.f32 %v5083_v27, %v3906_v12 }
0x1f05   :  { %v5085_v30 = vpop.eup %5084 }
0x1f06   :  { %v3921_v31 = vmul.f32 %v5085_v30, %v3905_v13  ;;  %v3928_v32 = vmul.f32 %v4454_v28, %v3922_v29 }
0x1f08   :  { %v3927_v35 = vmul.f32 %v4454_v28, %v3921_v31  ;;  %v5709_v39 = vadd.f32 %v4455_v33, %v3928_v32  ;;  %v4485_v32 = vld [vmem:[%s5832_s5 + $0x58] sm:$0xff] }
0x1f0a   :  { %v5707_v38 = vadd.f32 %v4455_v33, %v3927_v35  ;;  %v4484_v33 = vld [vmem:[%s5832_s5 + $0x50] sm:$0xff]  ;;  %v4483_v35 = vld [vmem:[%s5832_s5 + $0x48] sm:$0xff] }
0x1f0c   :  { %4928 = vmatprep.mubr.msk.f32.mxu0 %vm33_vm0, %v5707_v38 }
0x1f0d   :  { %4929 = vmatmul.mubr.msk.f32.vlgmr.msra.gmra.mxu0 %vm33_vm0, %v5709_v39 }
0x1f0e   :  { %4974 = vmatprep.mubr.msk.f32.mxu0 %vm5097_vm1, %v5096_v37  ;;  %4967 = vmatpush3.msra.mxu0 %v4485_v32 }
0x1f0f   :  { %4968 = vmatprep.subr.mxu0 %v5096_v37 }
0x1f10   :  { %4969 = vmatpush3.msra.mxu0 %v4484_v33 }
0x1f11   :  { %4970 = vmatprep.subr.mxu0 %v5096_v37 }
0x1f12   :  { %4971 = vmatpush3.msra.mxu0 %v4483_v35 }
0x1f13   :  { %4972 = vmatprep.subr.mxu0 %v5096_v37 }
0x1fcd   :  { %v4930_v55 = vpop.f32.mrf.mxu0 }
0x1fce   :  { %v4023_v25 = vadd.f32 %v4930_v55, %v4460_v54  ;;  %v4491_v55 = vld [vmem:[%s5829_s4 + $0x98] sm:$0xff] }
0x1fcf   :  { %v4017_v58 = vpop.f32.mrf.mxu0 }
0x1fd0   :  { %v4029_v59 = vmul.f32 0.044715, %v4023_v25  ;;  %v4018_v60 = vadd.f32 %v4460_v54, %v4017_v58  ;;  %v4027_v12 = vmul.f32 0.5, %v4023_v25  ;;  %v4489_v58 = vld [vmem:[%s5829_s4 + $0x88] sm:$0xff] }
0x1fd2   :  { %v4031_v61 = vmul.f32 %v4029_v59, %v4023_v25  ;;  %v4028_v62 = vmul.f32 0.044715, %v4018_v60  ;;  %v4026_v5 = vmul.f32 0.5, %v4018_v60  ;;  %v4488_v59 = vld [vmem:[%s5829_s4 + $0x80] sm:$0xff] }
0x1fd4   :  { %v4033_v63 = vmul.f32 %v4031_v61, %v4023_v25  ;;  %v4030_v0 = vmul.f32 %v4028_v62, %v4018_v60 }
0x1fd6   :  { %v4035_v1 = vadd.f32 %v4033_v63, %v4023_v25  ;;  %v4032_v2 = vmul.f32 %v4030_v0, %v4018_v60  ;;  %v4490_v25 = vld [vmem:[%s5829_s4 + $0x90] sm:$0xff] }
0x1fd8   :  { %v4034_v3 = vadd.f32 %v4032_v2, %v4018_v60  ;;  %v4037_v4 = vmul.f32 0.7978846, %v4035_v1  ;;  %v4486_v60 = vld [vmem:[%s5830_s3 + $0x2] ss:$0 sm:$0xff]  ;;  %v4492_v1 = vld [vmem:[%s5830_s3 + $0x3] ss:$0 sm:$0xff] }
0x1fda   :  { %v4036_v6 = vmul.f32 0.7978846, %v4034_v3  ;;  %5086 = vtanh.f32 %v4037_v4 }
0x1fdc   :  { %5088 = vtanh.f32 %v4036_v6 }
0x1fe7   :  { %v5087_v8 = vpop.eup %5086 }
0x1fe8   :  { %v4041_v10 = vadd.f32 1.0, %v5087_v8 }
0x1fe9   :  { %v5089_v9 = vpop.eup %5088 }
0x1fea   :  { %v4040_v11 = vadd.f32 1.0, %v5089_v9  ;;  %v4043_v13 = vmul.f32 %v4041_v10, %v4027_v12 }
0x1fec   :  { %v4042_v7 = vmul.f32 %v4040_v11, %v4026_v5 }
0x1fee   :  { %4963 = vmatprep.mubr.f32.mxu1 %v4042_v7 }
0x1fef   :  { %4964 = vmatmul.mubr.f32.vlgmr.msra.gmra.mxu1 %v4043_v13 }
0x20af   :  { %v4965_v15 = vpop.f32.mrf.mxu1 }
0x20b0   :  { %v4138_v16 = vadd.f32 %v4965_v15, %v4479_v14 }
0x20b1   :  { %v4132_v42 = vpop.f32.mrf.mxu1 }
0x20b2   :  { %v4133_v20 = vadd.f32 %v4479_v14, %v4132_v42  ;;  %v4142_v17 = vadd.f32 %v4138_v16, %v5709_v39 }
0x20b4   :  { %v4148_v40 = vsel %vm33_vm0, %v4142_v17, 0.0  ;;  %v4141_v18 = vadd.f32 %v4133_v20, %v5707_v38  ;;  %v4482_v38 = vld [vmem:[%s5832_s5 + $0x40] sm:$0xff] }
0x20b5   :  { %4149 = vadd.xlane.f32.xlu0 %v4148_v40  ;;  %4973 = vmatpush3.msra.mxu0 %v4482_v38 }
0x20b6   :  { %v4145_v19 = vsel %vm33_vm0, %v4141_v18, 0.0  ;;  %4977 = vmatprep.subr.mxu0 %v5096_v37 }
0x20b7   :  { %4146 = vadd.xlane.f32.xlu1 %v4145_v19 }
0x213e   :  { %v4150_v21 = vpop.xlane.xlu0 %4149 }
0x213f   :  { %v4152_v22 = vmul.f32 0.03125, %v4150_v21 }
0x2140   :  { %v4147_v24 = vpop.xlane.xlu1 %4146 }
0x2141   :  { %v4154_v26 = vsub.f32 %v4142_v17, %v4152_v22  ;;  %v4151_v57 = vmul.f32 0.03125, %v4147_v24 }
0x2143   :  { %v4153_v27 = vsub.f32 %v4141_v18, %v4151_v57  ;;  %v4156_v28 = vmul.f32 %v4154_v26, %v4154_v26 }
0x2145   :  { %v4160_v29 = vsel %vm33_vm0, %v4156_v28, 0.0  ;;  %v4155_v30 = vmul.f32 %v4153_v27, %v4153_v27 }
0x2146   :  { %4161 = vadd.xlane.f32.xlu0 %v4160_v29 }
0x2147   :  { %v4157_v31 = vsel %vm33_vm0, %v4155_v30, 0.0 }
0x2148   :  { %4158 = vadd.xlane.f32.xlu1 %v4157_v31 }
0x21cf   :  { %v4162_v39 = vpop.xlane.xlu0 %4161 }
0x21d0   :  { %v4164_v41 = vmul.f32 0.03125, %v4162_v39 }
0x21d1   :  { %v4159_v45 = vpop.xlane.xlu1 %4158 }
0x21d2   :  { %v4166_v46 = vadd.f32 1e-12, %v4164_v41  ;;  %v4163_v47 = vmul.f32 0.03125, %v4159_v45 }
0x21d4   :  { %5090 = vrsqrt.f32 %v4166_v46  ;;  %v4165_v48 = vadd.f32 1e-12, %v4163_v47 }
0x21d6   :  { %5092 = vrsqrt.f32 %v4165_v48 }
0x21e1   :  { %v5091_v36 = vpop.eup %5090 }
0x21e2   :  { %v4170_v34 = vmul.f32 %v5091_v36, %v4154_v26 }
0x21e3   :  { %v5093_v44 = vpop.eup %5092 }
0x21e4   :  { %v4169_v56 = vmul.f32 %v5093_v44, %v4153_v27  ;;  %v4176_v50 = vmul.f32 %v4480_v43, %v4170_v34 }
0x21e6   :  { %v4175_v51 = vmul.f32 %v4480_v43, %v4169_v56  ;;  %v4182_v52 = vadd.f32 %v4481_v49, %v4176_v50 }
0x21e8   :  { %v4181_v23 = vadd.f32 %v4481_v49, %v4175_v51  ;;  %v4195_v53 = vrot.slane %v4182_v52, 7 }
0x21ea   :  { %v4197_v54 = vsel %vm4196_vm3, %v4195_v53, %v4181_v23 }
0x21eb   :  { %4975 = vmatmul.mubr.msk.f32.vlgmr.msra.gmra.mxu0 %vm33_vm0, %v4197_v54 }
0x21ec   :  { %4985 = vmatprep.mubr.msk.f32.mxu0 %vm5097_vm1, %v5096_v37  ;;  %4978 = vmatpush3.msra.mxu0 %v4491_v55 }
0x21ed   :  { %4979 = vmatprep.subr.mxu0 %v5096_v37 }
0x21ee   :  { %4980 = vmatpush3.msra.mxu0 %v4490_v25 }
0x21ef   :  { %4981 = vmatprep.subr.mxu0 %v5096_v37 }
0x21f0   :  { %4982 = vmatpush3.msra.mxu0 %v4489_v58 }
0x21f1   :  { %4983 = vmatprep.subr.mxu0 %v5096_v37 }
0x21f2   :  { %4984 = vmatpush3.msra.mxu0 %v4488_v59 }
0x22ab   :  { %v4266_v61 = vpop.f32.mrf.mxu0 }
0x22ac   :  { %v4267_v62 = vadd.f32 %v4486_v60, %v4266_v61 }
0x22ad   :  { %v4976_v63 = vpop.f32.mrf.mxu0 }
0x22ae   :  { %5094 = vtanh.f32 %v4267_v62 }
0x22bb   :  { %v5095_v0 = vpop.eup %5094 }
0x22bc   :  { %4986 = vmatmul.mubr.msk.f32.vlgmr.msra.gmra.mxu0 %vm33_vm0, %v5095_v0 }
0x237c   :  { %v4350_v2 = vpop.f32.mrf.mxu0 }
0x237d   :  { %v4351_v3 = vadd.f32 %v4492_v1, %v4350_v2 }
0x237e   :  { %v4987_v4 = vpop.f32.mrf.mxu0 }
0x237f   :  { %4354 = vst [vmem:[%s5834_s7] sm:$0x3] %v4351_v3 }

</bundles_post_ra>
